<compile_context>
chip_gen: v7x
topology: tpu7x:2x2x1
jax: 0.10.0
libtpu: 0.0.40
codegen_flags: <defaults>
</compile_context>

<pallas_src>
import math

import jax
import jax.numpy as jnp
from jax.experimental import pallas as pl
from jax.experimental.pallas import tpu as pltpu

# ----------------------------- configuration --------------------------------
IMG = 32                      # small version of img_size=224
PATCH = 8                     # small version of patch_size=16
IN_CH = 3
ENC_DIM = 64                  # small version of embed_dim=768
ENC_DEPTH = 2                 # small version of depth=12
ENC_HEADS = 4                 # small version of num_heads=12
HEAD_DIM = ENC_DIM // ENC_HEADS
MLP_RATIO = 4
HID = ENC_DIM * MLP_RATIO
BATCH = 2
N_PATCH = (IMG // PATCH) ** 2        # 16 tokens
CPP = IN_CH * PATCH * PATCH          # flattened patch size (192)
LN_EPS = 1e-5                        # nn.LayerNorm default
DTYPE = jnp.float32


# ------------------------------ fused kernel ---------------------------------
def _encoder_kernel(xp_ref, patch_w_ref, patch_b_ref, pos_ref,
                    ln1_g_ref, ln1_b_ref,
                    w_qkv_ref, w_proj_ref, b_proj_ref,
                    ln2_g_ref, ln2_b_ref,
                    w_fc1_ref, b_fc1_ref, w_fc2_ref, b_fc2_ref,
                    norm_g_ref, norm_b_ref,
                    o_ref):
    """One grid step = full encoder forward for one batch element (all in VMEM)."""
    f32 = jnp.float32

    def layer_norm(v, g, b):
        mu = jnp.mean(v, axis=-1, keepdims=True)
        var = jnp.mean((v - mu) ** 2, axis=-1, keepdims=True)
        return (v - mu) * jax.lax.rsqrt(var + LN_EPS) * g + b

    # PatchEmbed (Conv2d k=s=P == flattened-patch matmul) + pos_embed[:, 1:, :]
    x = jnp.dot(xp_ref[0], patch_w_ref[...], preferred_element_type=f32)
    x = x + patch_b_ref[...] + pos_ref[...]

    scale = 1.0 / math.sqrt(HEAD_DIM)
    for d in range(ENC_DEPTH):                       # static unroll (depth=2)
        # ---------------- multi-head self-attention ----------------
        y = layer_norm(x, ln1_g_ref[d], ln1_b_ref[d])
        # single fused QKV matmul: (N, D) @ (D, 3D)  (columns ordered q|k|v,
        # each grouped head-major, matching PyTorch's qkv.reshape(3, H, Dh))
        qkv = jnp.dot(y, w_qkv_ref[d], preferred_element_type=f32)
        heads = []
        for h in range(ENC_HEADS):                   # static unroll (heads=4)
            q = qkv[:, h * HEAD_DIM:(h + 1) * HEAD_DIM] * scale
            k = qkv[:, ENC_DIM + h * HEAD_DIM:ENC_DIM + (h + 1) * HEAD_DIM]
            v = qkv[:, 2 * ENC_DIM + h * HEAD_DIM:2 * ENC_DIM + (h + 1) * HEAD_DIM]
            # scores = q @ k^T without an explicit transpose (contract last dims)
            s = jax.lax.dot_general(q, k, (((1,), (1,)), ((), ())),
                                    preferred_element_type=f32)
            p = jnp.exp(s - jnp.max(s, axis=-1, keepdims=True))
            p = p * pl.reciprocal(jnp.sum(p, axis=-1, keepdims=True), approx=True)
            heads.append(jnp.dot(p, v, preferred_element_type=f32))
        ov = jnp.concatenate(heads, axis=-1)          # (N, D) lane concat
        # single output projection matmul + bias, then residual
        x = x + jnp.dot(ov, w_proj_ref[d], preferred_element_type=f32) + b_proj_ref[d]
        # ---------------------------- MLP ---------------------------
        y = layer_norm(x, ln2_g_ref[d], ln2_b_ref[d])
        hdn = jnp.dot(y, w_fc1_ref[d], preferred_element_type=f32) + b_fc1_ref[d]
        hdn = 0.5 * hdn * (1.0 + jax.lax.erf(hdn * 0.7071067811865476))  # exact GELU
        x = x + jnp.dot(hdn, w_fc2_ref[d], preferred_element_type=f32) + b_fc2_ref[d]

    # final LayerNorm; head is nn.Identity (num_classes=0)
    # TODO(synk): output last dim (64) < 128 lanes -> one small masked store; the
    # model's embed_dim fixes this width and total traffic is 8 KiB, so left as-is.
    o_ref[0] = layer_norm(x, norm_g_ref[...], norm_b_ref[...]).astype(o_ref.dtype)


# ------------------------------ wrapper ---------------------------------------
def _full_spec(shape):
    zeros = (0,) * len(shape)
    return pl.BlockSpec(shape, lambda b, z=zeros: z)


def _cost_numbers(b, n, cpp):
    d, hid, hds, dh = ENC_DIM, HID, ENC_HEADS, HEAD_DIM
    per_blk = (2 * n * d * 3 * d              # fused qkv
               + hds * (4 * n * n * dh)       # scores + p@v
               + 2 * n * d * d                # output projection
               + 4 * n * d * hid)             # fc1 + fc2
    flops = b * (2 * n * cpp * d + ENC_DEPTH * per_blk)
    trans = b * ENC_DEPTH * (hds * n * n + n * hid)          # exp + erf
    params_bytes = 4 * (cpp * d + d + n * d
                        + ENC_DEPTH * (3 * d * d + d * d + 2 * d * hid
                                       + 6 * d + hid)
                        + 2 * d)
    bytes_acc = params_bytes + 4 * b * n * (cpp + d)
    return flops, trans, bytes_acc


def encoder_forward(params, x):
    """x: (B, C, H, W) NCHW like PyTorch. Returns (B, N_PATCH, ENC_DIM)."""
    B, C, H, W = x.shape
    P = PATCH
    gh, gw = H // P, W // P
    # layout glue (pure reshape/transpose): NCHW -> (B, N, C*P*P) flattened patches
    xp = x.reshape(B, C, gh, P, gw, P).transpose(0, 2, 4, 1, 3, 5)
    xp = xp.reshape(B, gh * gw, C * P * P)
    n, cpp = xp.shape[1], xp.shape[2]

    p = params
    args = (xp, p["patch_w"], p["patch_b"], p["pos"],
            p["ln1_g"], p["ln1_b"],
            p["w_qkv"], p["w_proj"], p["b_proj"],
            p["ln2_g"], p["ln2_b"],
            p["w_fc1"], p["b_fc1"], p["w_fc2"], p["b_fc2"],
            p["norm_g"], p["norm_b"])

    in_specs = [pl.BlockSpec((1, n, cpp), lambda b: (b, 0, 0))]
    in_specs += [_full_spec(a.shape) for a in args[1:]]

    flops, trans, bytes_acc = _cost_numbers(B, n, cpp)

    out = pl.pallas_call(
        _encoder_kernel,
        out_shape=jax.ShapeDtypeStruct((B, n, ENC_DIM), x.dtype),
        grid=(B,),
        in_specs=in_specs,
        out_specs=pl.BlockSpec((1, n, ENC_DIM), lambda b: (b, 0, 0)),
        compiler_params=pltpu.CompilerParams(dimension_semantics=("parallel",)),
        cost_estimate=pl.CostEstimate(flops=flops, transcendentals=trans,
                                      bytes_accessed=bytes_acc),
    )(*args)
    return out                                  # head is Identity (num_classes=0)


# ------------------------------ parameter init --------------------------------
def _xavier(key, fan_in, fan_out):
    lim = math.sqrt(6.0 / (fan_in + fan_out))
    return jax.random.uniform(key, (fan_in, fan_out), DTYPE, -lim, lim)


def init_params(key):
    D, depth = ENC_DIM, ENC_DEPTH
    kpw, kpos, kblk = jax.random.split(key, 3)

    # PatchEmbed conv weight flattened to (C*P*P, D)
    patch_w = _xavier(kpw, CPP, D)
    patch_b = jnp.zeros((1, D), DTYPE)

    # learnable pos_embed (1, N+1, D), trunc_normal(std=0.02); forward uses [:, 1:, :]
    pos_full = 0.02 * jax.random.truncated_normal(kpos, -1.0, 1.0,
                                                  (N_PATCH + 1, D), DTYPE)
    pos = pos_full[1:, :]

    keys = jax.random.split(kblk, 4 * depth)
    w_qkv, w_proj, w_fc1, w_fc2 = [], [], [], []
    for i in range(depth):
        kqkv, kproj, k1, k2 = keys[4 * i: 4 * i + 4]
        # columns of w_qkv ordered (3, heads, head_dim) as in PyTorch's qkv Linear
        w_qkv.append(_xavier(kqkv, D, 3 * D))
        w_proj.append(_xavier(kproj, D, D))
        w_fc1.append(_xavier(k1, D, HID))
        w_fc2.append(_xavier(k2, HID, D))

    return dict(
        patch_w=patch_w, patch_b=patch_b, pos=pos,
        ln1_g=jnp.ones((depth, 1, D), DTYPE), ln1_b=jnp.zeros((depth, 1, D), DTYPE),
        w_qkv=jnp.stack(w_qkv),
        w_proj=jnp.stack(w_proj), b_proj=jnp.zeros((depth, 1, D), DTYPE),
        ln2_g=jnp.ones((depth, 1, D), DTYPE), ln2_b=jnp.zeros((depth, 1, D), DTYPE),
        w_fc1=jnp.stack(w_fc1), b_fc1=jnp.zeros((depth, 1, HID), DTYPE),
        w_fc2=jnp.stack(w_fc2), b_fc2=jnp.zeros((depth, 1, D), DTYPE),
        norm_g=jnp.ones((1, D), DTYPE), norm_b=jnp.zeros((1, D), DTYPE),
    )


# ---------------------------------- main --------------------------------------
if __name__ == "__main__":
    key = jax.random.PRNGKey(0)
    kp, kx = jax.random.split(key)
    params = init_params(kp)

    x = jax.random.normal(kx, (BATCH, IN_CH, IMG, IMG), DTYPE)   # NCHW, like PyTorch

    fwd = jax.jit(encoder_forward)
    out = jax.block_until_ready(fwd(params, x))

    assert out.shape == (BATCH, N_PATCH, ENC_DIM), out.shape
    assert bool(jnp.all(jnp.isfinite(out)))
    print("KERNEL_OK")
</pallas_src>

<mosaic_0001>
module attributes {stable_mosaic.version = 11 : i64} {
  func.func @_encoder_kernel(%arg0: i32, %arg1: memref<1x16x192xf32, #tpu.memory_space<vmem>>, %arg2: memref<192x64xf32, #tpu.memory_space<vmem>>, %arg3: memref<1x64xf32, #tpu.memory_space<vmem>>, %arg4: memref<16x64xf32, #tpu.memory_space<vmem>>, %arg5: memref<2x1x64xf32, #tpu.memory_space<vmem>>, %arg6: memref<2x1x64xf32, #tpu.memory_space<vmem>>, %arg7: memref<2x64x192xf32, #tpu.memory_space<vmem>>, %arg8: memref<2x64x64xf32, #tpu.memory_space<vmem>>, %arg9: memref<2x1x64xf32, #tpu.memory_space<vmem>>, %arg10: memref<2x1x64xf32, #tpu.memory_space<vmem>>, %arg11: memref<2x1x64xf32, #tpu.memory_space<vmem>>, %arg12: memref<2x64x256xf32, #tpu.memory_space<vmem>>, %arg13: memref<2x1x256xf32, #tpu.memory_space<vmem>>, %arg14: memref<2x256x64xf32, #tpu.memory_space<vmem>>, %arg15: memref<2x1x64xf32, #tpu.memory_space<vmem>>, %arg16: memref<1x64xf32, #tpu.memory_space<vmem>>, %arg17: memref<1x64xf32, #tpu.memory_space<vmem>>, %arg18: memref<1x16x64xf32, #tpu.memory_space<vmem>>) attributes {dimension_semantics = [#tpu.dimension_semantics<parallel>], iteration_bounds = array<i64: 2>, scalar_prefetch = 0 : i64, scratch_operands = 0 : i64, tpu.core_type = #tpu.core_type<tc>, window_params = [{transform_indices = @transform_0, window_bounds = array<i64: 1, 16, 192>}, {pipeline_mode = #tpu.pipeline_mode<synchronous>, transform_indices = @transform_1, window_bounds = array<i64: 192, 64>}, {pipeline_mode = #tpu.pipeline_mode<synchronous>, transform_indices = @transform_2, window_bounds = array<i64: 1, 64>}, {pipeline_mode = #tpu.pipeline_mode<synchronous>, transform_indices = @transform_3, window_bounds = array<i64: 16, 64>}, {pipeline_mode = #tpu.pipeline_mode<synchronous>, transform_indices = @transform_4, window_bounds = array<i64: 2, 1, 64>}, {pipeline_mode = #tpu.pipeline_mode<synchronous>, transform_indices = @transform_5, window_bounds = array<i64: 2, 1, 64>}, {pipeline_mode = #tpu.pipeline_mode<synchronous>, transform_indices = @transform_6, window_bounds = array<i64: 2, 64, 192>}, {pipeline_mode = #tpu.pipeline_mode<synchronous>, transform_indices = @transform_7, window_bounds = array<i64: 2, 64, 64>}, {pipeline_mode = #tpu.pipeline_mode<synchronous>, transform_indices = @transform_8, window_bounds = array<i64: 2, 1, 64>}, {pipeline_mode = #tpu.pipeline_mode<synchronous>, transform_indices = @transform_9, window_bounds = array<i64: 2, 1, 64>}, {pipeline_mode = #tpu.pipeline_mode<synchronous>, transform_indices = @transform_10, window_bounds = array<i64: 2, 1, 64>}, {pipeline_mode = #tpu.pipeline_mode<synchronous>, transform_indices = @transform_11, window_bounds = array<i64: 2, 64, 256>}, {pipeline_mode = #tpu.pipeline_mode<synchronous>, transform_indices = @transform_12, window_bounds = array<i64: 2, 1, 256>}, {pipeline_mode = #tpu.pipeline_mode<synchronous>, transform_indices = @transform_13, window_bounds = array<i64: 2, 256, 64>}, {pipeline_mode = #tpu.pipeline_mode<synchronous>, transform_indices = @transform_14, window_bounds = array<i64: 2, 1, 64>}, {pipeline_mode = #tpu.pipeline_mode<synchronous>, transform_indices = @transform_15, window_bounds = array<i64: 1, 64>}, {pipeline_mode = #tpu.pipeline_mode<synchronous>, transform_indices = @transform_16, window_bounds = array<i64: 1, 64>}, {transform_indices = @transform_17, window_bounds = array<i64: 1, 16, 64>}]} {
    %c0 = arith.constant 0 : index
    %c0_0 = arith.constant 0 : index
    %c0_1 = arith.constant 0 : index
    %0 = vector.load %arg1[%c0, %c0_0, %c0_1] : memref<1x16x192xf32, #tpu.memory_space<vmem>>, vector<1x16x192xf32>
    %1 = vector.shape_cast %0 : vector<1x16x192xf32> to vector<16x192xf32>
    %c0_2 = arith.constant 0 : index
    %c0_3 = arith.constant 0 : index
    %2 = vector.load %arg2[%c0_2, %c0_3] : memref<192x64xf32, #tpu.memory_space<vmem>>, vector<192x64xf32>
    %cst = arith.constant dense<0.000000e+00> : vector<16x64xf32>
    %3 = tpu.matmul %1, %2, %cst {dimension_numbers = #tpu.dot_dimension_numbers<[1], [0], [0], [1], [0, 0, 1, 1], [], []>} : vector<16x192xf32>, vector<192x64xf32>, vector<16x64xf32> -> vector<16x64xf32>
    %c0_4 = arith.constant 0 : index
    %c0_5 = arith.constant 0 : index
    %4 = vector.load %arg3[%c0_4, %c0_5] : memref<1x64xf32, #tpu.memory_space<vmem>>, vector<1x64xf32>
    %5 = vector.broadcast %4 : vector<1x64xf32> to vector<16x64xf32>
    %6 = arith.addf %3, %5 : vector<16x64xf32>
    %c0_6 = arith.constant 0 : index
    %c0_7 = arith.constant 0 : index
    %7 = vector.load %arg4[%c0_6, %c0_7] : memref<16x64xf32, #tpu.memory_space<vmem>>, vector<16x64xf32>
    %8 = arith.addf %6, %7 : vector<16x64xf32>
    %c0_8 = arith.constant 0 : index
    %c0_9 = arith.constant 0 : index
    %c0_10 = arith.constant 0 : index
    %9 = vector.load %arg5[%c0_8, %c0_9, %c0_10] : memref<2x1x64xf32, #tpu.memory_space<vmem>>, vector<1x1x64xf32>
    %10 = vector.shape_cast %9 : vector<1x1x64xf32> to vector<1x64xf32>
    %c0_11 = arith.constant 0 : index
    %c0_12 = arith.constant 0 : index
    %c0_13 = arith.constant 0 : index
    %11 = vector.load %arg6[%c0_11, %c0_12, %c0_13] : memref<2x1x64xf32, #tpu.memory_space<vmem>>, vector<1x1x64xf32>
    %12 = vector.shape_cast %11 : vector<1x1x64xf32> to vector<1x64xf32>
    %cst_14 = arith.constant dense<0.000000e+00> : vector<16xf32>
    %13 = vector.multi_reduction <add>, %8, %cst_14 [1] : vector<16x64xf32> to vector<16xf32>
    %14 = vector.shape_cast %13 : vector<16xf32> to vector<16x1xf32>
    %cst_15 = arith.constant 6.400000e+01 : f32
    %15 = vector.broadcast %cst_15 : f32 to vector<16x1xf32>
    %16 = arith.divf %14, %15 : vector<16x1xf32>
    %17 = vector.broadcast %16 : vector<16x1xf32> to vector<16x64xf32>
    %18 = arith.subf %8, %17 : vector<16x64xf32>
    %19 = arith.mulf %18, %18 : vector<16x64xf32>
    %cst_16 = arith.constant dense<0.000000e+00> : vector<16xf32>
    %20 = vector.multi_reduction <add>, %19, %cst_16 [1] : vector<16x64xf32> to vector<16xf32>
    %21 = vector.shape_cast %20 : vector<16xf32> to vector<16x1xf32>
    %cst_17 = arith.constant 6.400000e+01 : f32
    %22 = vector.broadcast %cst_17 : f32 to vector<16x1xf32>
    %23 = arith.divf %21, %22 : vector<16x1xf32>
    %24 = vector.broadcast %16 : vector<16x1xf32> to vector<16x64xf32>
    %25 = arith.subf %8, %24 : vector<16x64xf32>
    %cst_18 = arith.constant 9.99999974E-6 : f32
    %26 = vector.broadcast %cst_18 : f32 to vector<16x1xf32>
    %27 = arith.addf %23, %26 : vector<16x1xf32>
    %28 = math.rsqrt %27 : vector<16x1xf32>
    %29 = vector.broadcast %28 : vector<16x1xf32> to vector<16x64xf32>
    %30 = arith.mulf %25, %29 : vector<16x64xf32>
    %31 = vector.broadcast %10 : vector<1x64xf32> to vector<16x64xf32>
    %32 = arith.mulf %30, %31 : vector<16x64xf32>
    %33 = vector.broadcast %12 : vector<1x64xf32> to vector<16x64xf32>
    %34 = arith.addf %32, %33 : vector<16x64xf32>
    %c0_19 = arith.constant 0 : index
    %c0_20 = arith.constant 0 : index
    %c0_21 = arith.constant 0 : index
    %35 = vector.load %arg7[%c0_19, %c0_20, %c0_21] : memref<2x64x192xf32, #tpu.memory_space<vmem>>, vector<1x64x192xf32>
    %36 = vector.shape_cast %35 : vector<1x64x192xf32> to vector<64x192xf32>
    %cst_22 = arith.constant dense<0.000000e+00> : vector<16x192xf32>
    %37 = tpu.matmul %34, %36, %cst_22 {dimension_numbers = #tpu.dot_dimension_numbers<[1], [0], [0], [1], [0, 0, 1, 1], [], []>} : vector<16x64xf32>, vector<64x192xf32>, vector<16x192xf32> -> vector<16x192xf32>
    %38 = vector.extract_strided_slice %37 {offsets = [0, 0], sizes = [16, 16], strides = [1, 1]} : vector<16x192xf32> to vector<16x16xf32>
    %cst_23 = arith.constant 2.500000e-01 : f32
    %39 = vector.broadcast %cst_23 : f32 to vector<16x16xf32>
    %40 = arith.mulf %38, %39 : vector<16x16xf32>
    %41 = vector.extract_strided_slice %37 {offsets = [0, 64], sizes = [16, 16], strides = [1, 1]} : vector<16x192xf32> to vector<16x16xf32>
    %42 = vector.extract_strided_slice %37 {offsets = [0, 128], sizes = [16, 16], strides = [1, 1]} : vector<16x192xf32> to vector<16x16xf32>
    %cst_24 = arith.constant dense<0.000000e+00> : vector<16x16xf32>
    %43 = tpu.matmul %40, %41, %cst_24 {dimension_numbers = #tpu.dot_dimension_numbers<[1], [1], [0], [0], [0, 0, 1, 0], [], []>} : vector<16x16xf32>, vector<16x16xf32>, vector<16x16xf32> -> vector<16x16xf32>
    %cst_25 = arith.constant dense<0xFF800000> : vector<16xf32>
    %44 = vector.multi_reduction <maximumf>, %43, %cst_25 [1] : vector<16x16xf32> to vector<16xf32>
    %45 = vector.shape_cast %44 : vector<16xf32> to vector<16x1xf32>
    %46 = vector.broadcast %45 : vector<16x1xf32> to vector<16x16xf32>
    %47 = arith.subf %43, %46 : vector<16x16xf32>
    %48 = math.exp %47 : vector<16x16xf32>
    %cst_26 = arith.constant dense<0.000000e+00> : vector<16xf32>
    %49 = vector.multi_reduction <add>, %48, %cst_26 [1] : vector<16x16xf32> to vector<16xf32>
    %50 = vector.shape_cast %49 : vector<16xf32> to vector<16x1xf32>
    %51 = tpu.reciprocal %50 {approx = true} : vector<16x1xf32> -> vector<16x1xf32>
    %52 = vector.broadcast %51 : vector<16x1xf32> to vector<16x16xf32>
    %53 = arith.mulf %48, %52 : vector<16x16xf32>
    %cst_27 = arith.constant dense<0.000000e+00> : vector<16x16xf32>
    %54 = tpu.matmul %53, %42, %cst_27 {dimension_numbers = #tpu.dot_dimension_numbers<[1], [0], [0], [1], [0, 0, 1, 1], [], []>} : vector<16x16xf32>, vector<16x16xf32>, vector<16x16xf32> -> vector<16x16xf32>
    %55 = vector.extract_strided_slice %37 {offsets = [0, 16], sizes = [16, 16], strides = [1, 1]} : vector<16x192xf32> to vector<16x16xf32>
    %cst_28 = arith.constant 2.500000e-01 : f32
    %56 = vector.broadcast %cst_28 : f32 to vector<16x16xf32>
    %57 = arith.mulf %55, %56 : vector<16x16xf32>
    %58 = vector.extract_strided_slice %37 {offsets = [0, 80], sizes = [16, 16], strides = [1, 1]} : vector<16x192xf32> to vector<16x16xf32>
    %59 = vector.extract_strided_slice %37 {offsets = [0, 144], sizes = [16, 16], strides = [1, 1]} : vector<16x192xf32> to vector<16x16xf32>
    %cst_29 = arith.constant dense<0.000000e+00> : vector<16x16xf32>
    %60 = tpu.matmul %57, %58, %cst_29 {dimension_numbers = #tpu.dot_dimension_numbers<[1], [1], [0], [0], [0, 0, 1, 0], [], []>} : vector<16x16xf32>, vector<16x16xf32>, vector<16x16xf32> -> vector<16x16xf32>
    %cst_30 = arith.constant dense<0xFF800000> : vector<16xf32>
    %61 = vector.multi_reduction <maximumf>, %60, %cst_30 [1] : vector<16x16xf32> to vector<16xf32>
    %62 = vector.shape_cast %61 : vector<16xf32> to vector<16x1xf32>
    %63 = vector.broadcast %62 : vector<16x1xf32> to vector<16x16xf32>
    %64 = arith.subf %60, %63 : vector<16x16xf32>
    %65 = math.exp %64 : vector<16x16xf32>
    %cst_31 = arith.constant dense<0.000000e+00> : vector<16xf32>
    %66 = vector.multi_reduction <add>, %65, %cst_31 [1] : vector<16x16xf32> to vector<16xf32>
    %67 = vector.shape_cast %66 : vector<16xf32> to vector<16x1xf32>
    %68 = tpu.reciprocal %67 {approx = true} : vector<16x1xf32> -> vector<16x1xf32>
    %69 = vector.broadcast %68 : vector<16x1xf32> to vector<16x16xf32>
    %70 = arith.mulf %65, %69 : vector<16x16xf32>
    %cst_32 = arith.constant dense<0.000000e+00> : vector<16x16xf32>
    %71 = tpu.matmul %70, %59, %cst_32 {dimension_numbers = #tpu.dot_dimension_numbers<[1], [0], [0], [1], [0, 0, 1, 1], [], []>} : vector<16x16xf32>, vector<16x16xf32>, vector<16x16xf32> -> vector<16x16xf32>
    %72 = vector.extract_strided_slice %37 {offsets = [0, 32], sizes = [16, 16], strides = [1, 1]} : vector<16x192xf32> to vector<16x16xf32>
    %cst_33 = arith.constant 2.500000e-01 : f32
    %73 = vector.broadcast %cst_33 : f32 to vector<16x16xf32>
    %74 = arith.mulf %72, %73 : vector<16x16xf32>
    %75 = vector.extract_strided_slice %37 {offsets = [0, 96], sizes = [16, 16], strides = [1, 1]} : vector<16x192xf32> to vector<16x16xf32>
    %76 = vector.extract_strided_slice %37 {offsets = [0, 160], sizes = [16, 16], strides = [1, 1]} : vector<16x192xf32> to vector<16x16xf32>
    %cst_34 = arith.constant dense<0.000000e+00> : vector<16x16xf32>
    %77 = tpu.matmul %74, %75, %cst_34 {dimension_numbers = #tpu.dot_dimension_numbers<[1], [1], [0], [0], [0, 0, 1, 0], [], []>} : vector<16x16xf32>, vector<16x16xf32>, vector<16x16xf32> -> vector<16x16xf32>
    %cst_35 = arith.constant dense<0xFF800000> : vector<16xf32>
    %78 = vector.multi_reduction <maximumf>, %77, %cst_35 [1] : vector<16x16xf32> to vector<16xf32>
    %79 = vector.shape_cast %78 : vector<16xf32> to vector<16x1xf32>
    %80 = vector.broadcast %79 : vector<16x1xf32> to vector<16x16xf32>
    %81 = arith.subf %77, %80 : vector<16x16xf32>
    %82 = math.exp %81 : vector<16x16xf32>
    %cst_36 = arith.constant dense<0.000000e+00> : vector<16xf32>
    %83 = vector.multi_reduction <add>, %82, %cst_36 [1] : vector<16x16xf32> to vector<16xf32>
    %84 = vector.shape_cast %83 : vector<16xf32> to vector<16x1xf32>
    %85 = tpu.reciprocal %84 {approx = true} : vector<16x1xf32> -> vector<16x1xf32>
    %86 = vector.broadcast %85 : vector<16x1xf32> to vector<16x16xf32>
    %87 = arith.mulf %82, %86 : vector<16x16xf32>
    %cst_37 = arith.constant dense<0.000000e+00> : vector<16x16xf32>
    %88 = tpu.matmul %87, %76, %cst_37 {dimension_numbers = #tpu.dot_dimension_numbers<[1], [0], [0], [1], [0, 0, 1, 1], [], []>} : vector<16x16xf32>, vector<16x16xf32>, vector<16x16xf32> -> vector<16x16xf32>
    %89 = vector.extract_strided_slice %37 {offsets = [0, 48], sizes = [16, 16], strides = [1, 1]} : vector<16x192xf32> to vector<16x16xf32>
    %cst_38 = arith.constant 2.500000e-01 : f32
    %90 = vector.broadcast %cst_38 : f32 to vector<16x16xf32>
    %91 = arith.mulf %89, %90 : vector<16x16xf32>
    %92 = vector.extract_strided_slice %37 {offsets = [0, 112], sizes = [16, 16], strides = [1, 1]} : vector<16x192xf32> to vector<16x16xf32>
    %93 = vector.extract_strided_slice %37 {offsets = [0, 176], sizes = [16, 16], strides = [1, 1]} : vector<16x192xf32> to vector<16x16xf32>
    %cst_39 = arith.constant dense<0.000000e+00> : vector<16x16xf32>
    %94 = tpu.matmul %91, %92, %cst_39 {dimension_numbers = #tpu.dot_dimension_numbers<[1], [1], [0], [0], [0, 0, 1, 0], [], []>} : vector<16x16xf32>, vector<16x16xf32>, vector<16x16xf32> -> vector<16x16xf32>
    %cst_40 = arith.constant dense<0xFF800000> : vector<16xf32>
    %95 = vector.multi_reduction <maximumf>, %94, %cst_40 [1] : vector<16x16xf32> to vector<16xf32>
    %96 = vector.shape_cast %95 : vector<16xf32> to vector<16x1xf32>
    %97 = vector.broadcast %96 : vector<16x1xf32> to vector<16x16xf32>
    %98 = arith.subf %94, %97 : vector<16x16xf32>
    %99 = math.exp %98 : vector<16x16xf32>
    %cst_41 = arith.constant dense<0.000000e+00> : vector<16xf32>
    %100 = vector.multi_reduction <add>, %99, %cst_41 [1] : vector<16x16xf32> to vector<16xf32>
    %101 = vector.shape_cast %100 : vector<16xf32> to vector<16x1xf32>
    %102 = tpu.reciprocal %101 {approx = true} : vector<16x1xf32> -> vector<16x1xf32>
    %103 = vector.broadcast %102 : vector<16x1xf32> to vector<16x16xf32>
    %104 = arith.mulf %99, %103 : vector<16x16xf32>
    %cst_42 = arith.constant dense<0.000000e+00> : vector<16x16xf32>
    %105 = tpu.matmul %104, %93, %cst_42 {dimension_numbers = #tpu.dot_dimension_numbers<[1], [0], [0], [1], [0, 0, 1, 1], [], []>} : vector<16x16xf32>, vector<16x16xf32>, vector<16x16xf32> -> vector<16x16xf32>
    %106 = tpu.concatenate %54, %71, %88, %105 in 1 : vector<16x16xf32>, vector<16x16xf32>, vector<16x16xf32>, vector<16x16xf32> -> vector<16x64xf32>
    %c0_43 = arith.constant 0 : index
    %c0_44 = arith.constant 0 : index
    %c0_45 = arith.constant 0 : index
    %107 = vector.load %arg8[%c0_43, %c0_44, %c0_45] : memref<2x64x64xf32, #tpu.memory_space<vmem>>, vector<1x64x64xf32>
    %108 = vector.shape_cast %107 : vector<1x64x64xf32> to vector<64x64xf32>
    %cst_46 = arith.constant dense<0.000000e+00> : vector<16x64xf32>
    %109 = tpu.matmul %106, %108, %cst_46 {dimension_numbers = #tpu.dot_dimension_numbers<[1], [0], [0], [1], [0, 0, 1, 1], [], []>} : vector<16x64xf32>, vector<64x64xf32>, vector<16x64xf32> -> vector<16x64xf32>
    %110 = arith.addf %8, %109 : vector<16x64xf32>
    %c0_47 = arith.constant 0 : index
    %c0_48 = arith.constant 0 : index
    %c0_49 = arith.constant 0 : index
    %111 = vector.load %arg9[%c0_47, %c0_48, %c0_49] : memref<2x1x64xf32, #tpu.memory_space<vmem>>, vector<1x1x64xf32>
    %112 = vector.shape_cast %111 : vector<1x1x64xf32> to vector<1x64xf32>
    %113 = vector.broadcast %112 : vector<1x64xf32> to vector<16x64xf32>
    %114 = arith.addf %110, %113 : vector<16x64xf32>
    %c0_50 = arith.constant 0 : index
    %c0_51 = arith.constant 0 : index
    %c0_52 = arith.constant 0 : index
    %115 = vector.load %arg10[%c0_50, %c0_51, %c0_52] : memref<2x1x64xf32, #tpu.memory_space<vmem>>, vector<1x1x64xf32>
    %116 = vector.shape_cast %115 : vector<1x1x64xf32> to vector<1x64xf32>
    %c0_53 = arith.constant 0 : index
    %c0_54 = arith.constant 0 : index
    %c0_55 = arith.constant 0 : index
    %117 = vector.load %arg11[%c0_53, %c0_54, %c0_55] : memref<2x1x64xf32, #tpu.memory_space<vmem>>, vector<1x1x64xf32>
    %118 = vector.shape_cast %117 : vector<1x1x64xf32> to vector<1x64xf32>
    %cst_56 = arith.constant dense<0.000000e+00> : vector<16xf32>
    %119 = vector.multi_reduction <add>, %114, %cst_56 [1] : vector<16x64xf32> to vector<16xf32>
    %120 = vector.shape_cast %119 : vector<16xf32> to vector<16x1xf32>
    %cst_57 = arith.constant 6.400000e+01 : f32
    %121 = vector.broadcast %cst_57 : f32 to vector<16x1xf32>
    %122 = arith.divf %120, %121 : vector<16x1xf32>
    %123 = vector.broadcast %122 : vector<16x1xf32> to vector<16x64xf32>
    %124 = arith.subf %114, %123 : vector<16x64xf32>
    %125 = arith.mulf %124, %124 : vector<16x64xf32>
    %cst_58 = arith.constant dense<0.000000e+00> : vector<16xf32>
    %126 = vector.multi_reduction <add>, %125, %cst_58 [1] : vector<16x64xf32> to vector<16xf32>
    %127 = vector.shape_cast %126 : vector<16xf32> to vector<16x1xf32>
    %cst_59 = arith.constant 6.400000e+01 : f32
    %128 = vector.broadcast %cst_59 : f32 to vector<16x1xf32>
    %129 = arith.divf %127, %128 : vector<16x1xf32>
    %130 = vector.broadcast %122 : vector<16x1xf32> to vector<16x64xf32>
    %131 = arith.subf %114, %130 : vector<16x64xf32>
    %cst_60 = arith.constant 9.99999974E-6 : f32
    %132 = vector.broadcast %cst_60 : f32 to vector<16x1xf32>
    %133 = arith.addf %129, %132 : vector<16x1xf32>
    %134 = math.rsqrt %133 : vector<16x1xf32>
    %135 = vector.broadcast %134 : vector<16x1xf32> to vector<16x64xf32>
    %136 = arith.mulf %131, %135 : vector<16x64xf32>
    %137 = vector.broadcast %116 : vector<1x64xf32> to vector<16x64xf32>
    %138 = arith.mulf %136, %137 : vector<16x64xf32>
    %139 = vector.broadcast %118 : vector<1x64xf32> to vector<16x64xf32>
    %140 = arith.addf %138, %139 : vector<16x64xf32>
    %c0_61 = arith.constant 0 : index
    %c0_62 = arith.constant 0 : index
    %c0_63 = arith.constant 0 : index
    %141 = vector.load %arg12[%c0_61, %c0_62, %c0_63] : memref<2x64x256xf32, #tpu.memory_space<vmem>>, vector<1x64x256xf32>
    %142 = vector.shape_cast %141 : vector<1x64x256xf32> to vector<64x256xf32>
    %cst_64 = arith.constant dense<0.000000e+00> : vector<16x256xf32>
    %143 = tpu.matmul %140, %142, %cst_64 {dimension_numbers = #tpu.dot_dimension_numbers<[1], [0], [0], [1], [0, 0, 1, 1], [], []>} : vector<16x64xf32>, vector<64x256xf32>, vector<16x256xf32> -> vector<16x256xf32>
    %c0_65 = arith.constant 0 : index
    %c0_66 = arith.constant 0 : index
    %c0_67 = arith.constant 0 : index
    %144 = vector.load %arg13[%c0_65, %c0_66, %c0_67] : memref<2x1x256xf32, #tpu.memory_space<vmem>>, vector<1x1x256xf32>
    %145 = vector.shape_cast %144 : vector<1x1x256xf32> to vector<1x256xf32>
    %146 = vector.broadcast %145 : vector<1x256xf32> to vector<16x256xf32>
    %147 = arith.addf %143, %146 : vector<16x256xf32>
    %cst_68 = arith.constant 5.000000e-01 : f32
    %148 = vector.broadcast %cst_68 : f32 to vector<16x256xf32>
    %149 = arith.mulf %148, %147 : vector<16x256xf32>
    %cst_69 = arith.constant 0.707106769 : f32
    %150 = vector.broadcast %cst_69 : f32 to vector<16x256xf32>
    %151 = arith.mulf %147, %150 : vector<16x256xf32>
    %152 = math.erf %151 : vector<16x256xf32>
    %cst_70 = arith.constant 1.000000e+00 : f32
    %153 = vector.broadcast %cst_70 : f32 to vector<16x256xf32>
    %154 = arith.addf %153, %152 : vector<16x256xf32>
    %155 = arith.mulf %149, %154 : vector<16x256xf32>
    %c0_71 = arith.constant 0 : index
    %c0_72 = arith.constant 0 : index
    %c0_73 = arith.constant 0 : index
    %156 = vector.load %arg14[%c0_71, %c0_72, %c0_73] : memref<2x256x64xf32, #tpu.memory_space<vmem>>, vector<1x256x64xf32>
    %157 = vector.shape_cast %156 : vector<1x256x64xf32> to vector<256x64xf32>
    %cst_74 = arith.constant dense<0.000000e+00> : vector<16x64xf32>
    %158 = tpu.matmul %155, %157, %cst_74 {dimension_numbers = #tpu.dot_dimension_numbers<[1], [0], [0], [1], [0, 0, 1, 1], [], []>} : vector<16x256xf32>, vector<256x64xf32>, vector<16x64xf32> -> vector<16x64xf32>
    %159 = arith.addf %114, %158 : vector<16x64xf32>
    %c0_75 = arith.constant 0 : index
    %c0_76 = arith.constant 0 : index
    %c0_77 = arith.constant 0 : index
    %160 = vector.load %arg15[%c0_75, %c0_76, %c0_77] : memref<2x1x64xf32, #tpu.memory_space<vmem>>, vector<1x1x64xf32>
    %161 = vector.shape_cast %160 : vector<1x1x64xf32> to vector<1x64xf32>
    %162 = vector.broadcast %161 : vector<1x64xf32> to vector<16x64xf32>
    %163 = arith.addf %159, %162 : vector<16x64xf32>
    %c1 = arith.constant 1 : index
    %c0_78 = arith.constant 0 : index
    %c0_79 = arith.constant 0 : index
    %164 = vector.load %arg5[%c1, %c0_78, %c0_79] : memref<2x1x64xf32, #tpu.memory_space<vmem>>, vector<1x1x64xf32>
    %165 = vector.shape_cast %164 : vector<1x1x64xf32> to vector<1x64xf32>
    %c1_80 = arith.constant 1 : index
    %c0_81 = arith.constant 0 : index
    %c0_82 = arith.constant 0 : index
    %166 = vector.load %arg6[%c1_80, %c0_81, %c0_82] : memref<2x1x64xf32, #tpu.memory_space<vmem>>, vector<1x1x64xf32>
    %167 = vector.shape_cast %166 : vector<1x1x64xf32> to vector<1x64xf32>
    %cst_83 = arith.constant dense<0.000000e+00> : vector<16xf32>
    %168 = vector.multi_reduction <add>, %163, %cst_83 [1] : vector<16x64xf32> to vector<16xf32>
    %169 = vector.shape_cast %168 : vector<16xf32> to vector<16x1xf32>
    %cst_84 = arith.constant 6.400000e+01 : f32
    %170 = vector.broadcast %cst_84 : f32 to vector<16x1xf32>
    %171 = arith.divf %169, %170 : vector<16x1xf32>
    %172 = vector.broadcast %171 : vector<16x1xf32> to vector<16x64xf32>
    %173 = arith.subf %163, %172 : vector<16x64xf32>
    %174 = arith.mulf %173, %173 : vector<16x64xf32>
    %cst_85 = arith.constant dense<0.000000e+00> : vector<16xf32>
    %175 = vector.multi_reduction <add>, %174, %cst_85 [1] : vector<16x64xf32> to vector<16xf32>
    %176 = vector.shape_cast %175 : vector<16xf32> to vector<16x1xf32>
    %cst_86 = arith.constant 6.400000e+01 : f32
    %177 = vector.broadcast %cst_86 : f32 to vector<16x1xf32>
    %178 = arith.divf %176, %177 : vector<16x1xf32>
    %179 = vector.broadcast %171 : vector<16x1xf32> to vector<16x64xf32>
    %180 = arith.subf %163, %179 : vector<16x64xf32>
    %cst_87 = arith.constant 9.99999974E-6 : f32
    %181 = vector.broadcast %cst_87 : f32 to vector<16x1xf32>
    %182 = arith.addf %178, %181 : vector<16x1xf32>
    %183 = math.rsqrt %182 : vector<16x1xf32>
    %184 = vector.broadcast %183 : vector<16x1xf32> to vector<16x64xf32>
    %185 = arith.mulf %180, %184 : vector<16x64xf32>
    %186 = vector.broadcast %165 : vector<1x64xf32> to vector<16x64xf32>
    %187 = arith.mulf %185, %186 : vector<16x64xf32>
    %188 = vector.broadcast %167 : vector<1x64xf32> to vector<16x64xf32>
    %189 = arith.addf %187, %188 : vector<16x64xf32>
    %c1_88 = arith.constant 1 : index
    %c0_89 = arith.constant 0 : index
    %c0_90 = arith.constant 0 : index
    %190 = vector.load %arg7[%c1_88, %c0_89, %c0_90] : memref<2x64x192xf32, #tpu.memory_space<vmem>>, vector<1x64x192xf32>
    %191 = vector.shape_cast %190 : vector<1x64x192xf32> to vector<64x192xf32>
    %cst_91 = arith.constant dense<0.000000e+00> : vector<16x192xf32>
    %192 = tpu.matmul %189, %191, %cst_91 {dimension_numbers = #tpu.dot_dimension_numbers<[1], [0], [0], [1], [0, 0, 1, 1], [], []>} : vector<16x64xf32>, vector<64x192xf32>, vector<16x192xf32> -> vector<16x192xf32>
    %193 = vector.extract_strided_slice %192 {offsets = [0, 0], sizes = [16, 16], strides = [1, 1]} : vector<16x192xf32> to vector<16x16xf32>
    %cst_92 = arith.constant 2.500000e-01 : f32
    %194 = vector.broadcast %cst_92 : f32 to vector<16x16xf32>
    %195 = arith.mulf %193, %194 : vector<16x16xf32>
    %196 = vector.extract_strided_slice %192 {offsets = [0, 64], sizes = [16, 16], strides = [1, 1]} : vector<16x192xf32> to vector<16x16xf32>
    %197 = vector.extract_strided_slice %192 {offsets = [0, 128], sizes = [16, 16], strides = [1, 1]} : vector<16x192xf32> to vector<16x16xf32>
    %cst_93 = arith.constant dense<0.000000e+00> : vector<16x16xf32>
    %198 = tpu.matmul %195, %196, %cst_93 {dimension_numbers = #tpu.dot_dimension_numbers<[1], [1], [0], [0], [0, 0, 1, 0], [], []>} : vector<16x16xf32>, vector<16x16xf32>, vector<16x16xf32> -> vector<16x16xf32>
    %cst_94 = arith.constant dense<0xFF800000> : vector<16xf32>
    %199 = vector.multi_reduction <maximumf>, %198, %cst_94 [1] : vector<16x16xf32> to vector<16xf32>
    %200 = vector.shape_cast %199 : vector<16xf32> to vector<16x1xf32>
    %201 = vector.broadcast %200 : vector<16x1xf32> to vector<16x16xf32>
    %202 = arith.subf %198, %201 : vector<16x16xf32>
    %203 = math.exp %202 : vector<16x16xf32>
    %cst_95 = arith.constant dense<0.000000e+00> : vector<16xf32>
    %204 = vector.multi_reduction <add>, %203, %cst_95 [1] : vector<16x16xf32> to vector<16xf32>
    %205 = vector.shape_cast %204 : vector<16xf32> to vector<16x1xf32>
    %206 = tpu.reciprocal %205 {approx = true} : vector<16x1xf32> -> vector<16x1xf32>
    %207 = vector.broadcast %206 : vector<16x1xf32> to vector<16x16xf32>
    %208 = arith.mulf %203, %207 : vector<16x16xf32>
    %cst_96 = arith.constant dense<0.000000e+00> : vector<16x16xf32>
    %209 = tpu.matmul %208, %197, %cst_96 {dimension_numbers = #tpu.dot_dimension_numbers<[1], [0], [0], [1], [0, 0, 1, 1], [], []>} : vector<16x16xf32>, vector<16x16xf32>, vector<16x16xf32> -> vector<16x16xf32>
    %210 = vector.extract_strided_slice %192 {offsets = [0, 16], sizes = [16, 16], strides = [1, 1]} : vector<16x192xf32> to vector<16x16xf32>
    %cst_97 = arith.constant 2.500000e-01 : f32
    %211 = vector.broadcast %cst_97 : f32 to vector<16x16xf32>
    %212 = arith.mulf %210, %211 : vector<16x16xf32>
    %213 = vector.extract_strided_slice %192 {offsets = [0, 80], sizes = [16, 16], strides = [1, 1]} : vector<16x192xf32> to vector<16x16xf32>
    %214 = vector.extract_strided_slice %192 {offsets = [0, 144], sizes = [16, 16], strides = [1, 1]} : vector<16x192xf32> to vector<16x16xf32>
    %cst_98 = arith.constant dense<0.000000e+00> : vector<16x16xf32>
    %215 = tpu.matmul %212, %213, %cst_98 {dimension_numbers = #tpu.dot_dimension_numbers<[1], [1], [0], [0], [0, 0, 1, 0], [], []>} : vector<16x16xf32>, vector<16x16xf32>, vector<16x16xf32> -> vector<16x16xf32>
    %cst_99 = arith.constant dense<0xFF800000> : vector<16xf32>
    %216 = vector.multi_reduction <maximumf>, %215, %cst_99 [1] : vector<16x16xf32> to vector<16xf32>
    %217 = vector.shape_cast %216 : vector<16xf32> to vector<16x1xf32>
    %218 = vector.broadcast %217 : vector<16x1xf32> to vector<16x16xf32>
    %219 = arith.subf %215, %218 : vector<16x16xf32>
    %220 = math.exp %219 : vector<16x16xf32>
    %cst_100 = arith.constant dense<0.000000e+00> : vector<16xf32>
    %221 = vector.multi_reduction <add>, %220, %cst_100 [1] : vector<16x16xf32> to vector<16xf32>
    %222 = vector.shape_cast %221 : vector<16xf32> to vector<16x1xf32>
    %223 = tpu.reciprocal %222 {approx = true} : vector<16x1xf32> -> vector<16x1xf32>
    %224 = vector.broadcast %223 : vector<16x1xf32> to vector<16x16xf32>
    %225 = arith.mulf %220, %224 : vector<16x16xf32>
    %cst_101 = arith.constant dense<0.000000e+00> : vector<16x16xf32>
    %226 = tpu.matmul %225, %214, %cst_101 {dimension_numbers = #tpu.dot_dimension_numbers<[1], [0], [0], [1], [0, 0, 1, 1], [], []>} : vector<16x16xf32>, vector<16x16xf32>, vector<16x16xf32> -> vector<16x16xf32>
    %227 = vector.extract_strided_slice %192 {offsets = [0, 32], sizes = [16, 16], strides = [1, 1]} : vector<16x192xf32> to vector<16x16xf32>
    %cst_102 = arith.constant 2.500000e-01 : f32
    %228 = vector.broadcast %cst_102 : f32 to vector<16x16xf32>
    %229 = arith.mulf %227, %228 : vector<16x16xf32>
    %230 = vector.extract_strided_slice %192 {offsets = [0, 96], sizes = [16, 16], strides = [1, 1]} : vector<16x192xf32> to vector<16x16xf32>
    %231 = vector.extract_strided_slice %192 {offsets = [0, 160], sizes = [16, 16], strides = [1, 1]} : vector<16x192xf32> to vector<16x16xf32>
    %cst_103 = arith.constant dense<0.000000e+00> : vector<16x16xf32>
    %232 = tpu.matmul %229, %230, %cst_103 {dimension_numbers = #tpu.dot_dimension_numbers<[1], [1], [0], [0], [0, 0, 1, 0], [], []>} : vector<16x16xf32>, vector<16x16xf32>, vector<16x16xf32> -> vector<16x16xf32>
    %cst_104 = arith.constant dense<0xFF800000> : vector<16xf32>
    %233 = vector.multi_reduction <maximumf>, %232, %cst_104 [1] : vector<16x16xf32> to vector<16xf32>
    %234 = vector.shape_cast %233 : vector<16xf32> to vector<16x1xf32>
    %235 = vector.broadcast %234 : vector<16x1xf32> to vector<16x16xf32>
    %236 = arith.subf %232, %235 : vector<16x16xf32>
    %237 = math.exp %236 : vector<16x16xf32>
    %cst_105 = arith.constant dense<0.000000e+00> : vector<16xf32>
    %238 = vector.multi_reduction <add>, %237, %cst_105 [1] : vector<16x16xf32> to vector<16xf32>
    %239 = vector.shape_cast %238 : vector<16xf32> to vector<16x1xf32>
    %240 = tpu.reciprocal %239 {approx = true} : vector<16x1xf32> -> vector<16x1xf32>
    %241 = vector.broadcast %240 : vector<16x1xf32> to vector<16x16xf32>
    %242 = arith.mulf %237, %241 : vector<16x16xf32>
    %cst_106 = arith.constant dense<0.000000e+00> : vector<16x16xf32>
    %243 = tpu.matmul %242, %231, %cst_106 {dimension_numbers = #tpu.dot_dimension_numbers<[1], [0], [0], [1], [0, 0, 1, 1], [], []>} : vector<16x16xf32>, vector<16x16xf32>, vector<16x16xf32> -> vector<16x16xf32>
    %244 = vector.extract_strided_slice %192 {offsets = [0, 48], sizes = [16, 16], strides = [1, 1]} : vector<16x192xf32> to vector<16x16xf32>
    %cst_107 = arith.constant 2.500000e-01 : f32
    %245 = vector.broadcast %cst_107 : f32 to vector<16x16xf32>
    %246 = arith.mulf %244, %245 : vector<16x16xf32>
    %247 = vector.extract_strided_slice %192 {offsets = [0, 112], sizes = [16, 16], strides = [1, 1]} : vector<16x192xf32> to vector<16x16xf32>
    %248 = vector.extract_strided_slice %192 {offsets = [0, 176], sizes = [16, 16], strides = [1, 1]} : vector<16x192xf32> to vector<16x16xf32>
    %cst_108 = arith.constant dense<0.000000e+00> : vector<16x16xf32>
    %249 = tpu.matmul %246, %247, %cst_108 {dimension_numbers = #tpu.dot_dimension_numbers<[1], [1], [0], [0], [0, 0, 1, 0], [], []>} : vector<16x16xf32>, vector<16x16xf32>, vector<16x16xf32> -> vector<16x16xf32>
    %cst_109 = arith.constant dense<0xFF800000> : vector<16xf32>
    %250 = vector.multi_reduction <maximumf>, %249, %cst_109 [1] : vector<16x16xf32> to vector<16xf32>
    %251 = vector.shape_cast %250 : vector<16xf32> to vector<16x1xf32>
    %252 = vector.broadcast %251 : vector<16x1xf32> to vector<16x16xf32>
    %253 = arith.subf %249, %252 : vector<16x16xf32>
    %254 = math.exp %253 : vector<16x16xf32>
    %cst_110 = arith.constant dense<0.000000e+00> : vector<16xf32>
    %255 = vector.multi_reduction <add>, %254, %cst_110 [1] : vector<16x16xf32> to vector<16xf32>
    %256 = vector.shape_cast %255 : vector<16xf32> to vector<16x1xf32>
    %257 = tpu.reciprocal %256 {approx = true} : vector<16x1xf32> -> vector<16x1xf32>
    %258 = vector.broadcast %257 : vector<16x1xf32> to vector<16x16xf32>
    %259 = arith.mulf %254, %258 : vector<16x16xf32>
    %cst_111 = arith.constant dense<0.000000e+00> : vector<16x16xf32>
    %260 = tpu.matmul %259, %248, %cst_111 {dimension_numbers = #tpu.dot_dimension_numbers<[1], [0], [0], [1], [0, 0, 1, 1], [], []>} : vector<16x16xf32>, vector<16x16xf32>, vector<16x16xf32> -> vector<16x16xf32>
    %261 = tpu.concatenate %209, %226, %243, %260 in 1 : vector<16x16xf32>, vector<16x16xf32>, vector<16x16xf32>, vector<16x16xf32> -> vector<16x64xf32>
    %c1_112 = arith.constant 1 : index
    %c0_113 = arith.constant 0 : index
    %c0_114 = arith.constant 0 : index
    %262 = vector.load %arg8[%c1_112, %c0_113, %c0_114] : memref<2x64x64xf32, #tpu.memory_space<vmem>>, vector<1x64x64xf32>
    %263 = vector.shape_cast %262 : vector<1x64x64xf32> to vector<64x64xf32>
    %cst_115 = arith.constant dense<0.000000e+00> : vector<16x64xf32>
    %264 = tpu.matmul %261, %263, %cst_115 {dimension_numbers = #tpu.dot_dimension_numbers<[1], [0], [0], [1], [0, 0, 1, 1], [], []>} : vector<16x64xf32>, vector<64x64xf32>, vector<16x64xf32> -> vector<16x64xf32>
    %265 = arith.addf %163, %264 : vector<16x64xf32>
    %c1_116 = arith.constant 1 : index
    %c0_117 = arith.constant 0 : index
    %c0_118 = arith.constant 0 : index
    %266 = vector.load %arg9[%c1_116, %c0_117, %c0_118] : memref<2x1x64xf32, #tpu.memory_space<vmem>>, vector<1x1x64xf32>
    %267 = vector.shape_cast %266 : vector<1x1x64xf32> to vector<1x64xf32>
    %268 = vector.broadcast %267 : vector<1x64xf32> to vector<16x64xf32>
    %269 = arith.addf %265, %268 : vector<16x64xf32>
    %c1_119 = arith.constant 1 : index
    %c0_120 = arith.constant 0 : index
    %c0_121 = arith.constant 0 : index
    %270 = vector.load %arg10[%c1_119, %c0_120, %c0_121] : memref<2x1x64xf32, #tpu.memory_space<vmem>>, vector<1x1x64xf32>
    %271 = vector.shape_cast %270 : vector<1x1x64xf32> to vector<1x64xf32>
    %c1_122 = arith.constant 1 : index
    %c0_123 = arith.constant 0 : index
    %c0_124 = arith.constant 0 : index
    %272 = vector.load %arg11[%c1_122, %c0_123, %c0_124] : memref<2x1x64xf32, #tpu.memory_space<vmem>>, vector<1x1x64xf32>
    %273 = vector.shape_cast %272 : vector<1x1x64xf32> to vector<1x64xf32>
    %cst_125 = arith.constant dense<0.000000e+00> : vector<16xf32>
    %274 = vector.multi_reduction <add>, %269, %cst_125 [1] : vector<16x64xf32> to vector<16xf32>
    %275 = vector.shape_cast %274 : vector<16xf32> to vector<16x1xf32>
    %cst_126 = arith.constant 6.400000e+01 : f32
    %276 = vector.broadcast %cst_126 : f32 to vector<16x1xf32>
    %277 = arith.divf %275, %276 : vector<16x1xf32>
    %278 = vector.broadcast %277 : vector<16x1xf32> to vector<16x64xf32>
    %279 = arith.subf %269, %278 : vector<16x64xf32>
    %280 = arith.mulf %279, %279 : vector<16x64xf32>
    %cst_127 = arith.constant dense<0.000000e+00> : vector<16xf32>
    %281 = vector.multi_reduction <add>, %280, %cst_127 [1] : vector<16x64xf32> to vector<16xf32>
    %282 = vector.shape_cast %281 : vector<16xf32> to vector<16x1xf32>
    %cst_128 = arith.constant 6.400000e+01 : f32
    %283 = vector.broadcast %cst_128 : f32 to vector<16x1xf32>
    %284 = arith.divf %282, %283 : vector<16x1xf32>
    %285 = vector.broadcast %277 : vector<16x1xf32> to vector<16x64xf32>
    %286 = arith.subf %269, %285 : vector<16x64xf32>
    %cst_129 = arith.constant 9.99999974E-6 : f32
    %287 = vector.broadcast %cst_129 : f32 to vector<16x1xf32>
    %288 = arith.addf %284, %287 : vector<16x1xf32>
    %289 = math.rsqrt %288 : vector<16x1xf32>
    %290 = vector.broadcast %289 : vector<16x1xf32> to vector<16x64xf32>
    %291 = arith.mulf %286, %290 : vector<16x64xf32>
    %292 = vector.broadcast %271 : vector<1x64xf32> to vector<16x64xf32>
    %293 = arith.mulf %291, %292 : vector<16x64xf32>
    %294 = vector.broadcast %273 : vector<1x64xf32> to vector<16x64xf32>
    %295 = arith.addf %293, %294 : vector<16x64xf32>
    %c1_130 = arith.constant 1 : index
    %c0_131 = arith.constant 0 : index
    %c0_132 = arith.constant 0 : index
    %296 = vector.load %arg12[%c1_130, %c0_131, %c0_132] : memref<2x64x256xf32, #tpu.memory_space<vmem>>, vector<1x64x256xf32>
    %297 = vector.shape_cast %296 : vector<1x64x256xf32> to vector<64x256xf32>
    %cst_133 = arith.constant dense<0.000000e+00> : vector<16x256xf32>
    %298 = tpu.matmul %295, %297, %cst_133 {dimension_numbers = #tpu.dot_dimension_numbers<[1], [0], [0], [1], [0, 0, 1, 1], [], []>} : vector<16x64xf32>, vector<64x256xf32>, vector<16x256xf32> -> vector<16x256xf32>
    %c1_134 = arith.constant 1 : index
    %c0_135 = arith.constant 0 : index
    %c0_136 = arith.constant 0 : index
    %299 = vector.load %arg13[%c1_134, %c0_135, %c0_136] : memref<2x1x256xf32, #tpu.memory_space<vmem>>, vector<1x1x256xf32>
    %300 = vector.shape_cast %299 : vector<1x1x256xf32> to vector<1x256xf32>
    %301 = vector.broadcast %300 : vector<1x256xf32> to vector<16x256xf32>
    %302 = arith.addf %298, %301 : vector<16x256xf32>
    %cst_137 = arith.constant 5.000000e-01 : f32
    %303 = vector.broadcast %cst_137 : f32 to vector<16x256xf32>
    %304 = arith.mulf %303, %302 : vector<16x256xf32>
    %cst_138 = arith.constant 0.707106769 : f32
    %305 = vector.broadcast %cst_138 : f32 to vector<16x256xf32>
    %306 = arith.mulf %302, %305 : vector<16x256xf32>
    %307 = math.erf %306 : vector<16x256xf32>
    %cst_139 = arith.constant 1.000000e+00 : f32
    %308 = vector.broadcast %cst_139 : f32 to vector<16x256xf32>
    %309 = arith.addf %308, %307 : vector<16x256xf32>
    %310 = arith.mulf %304, %309 : vector<16x256xf32>
    %c1_140 = arith.constant 1 : index
    %c0_141 = arith.constant 0 : index
    %c0_142 = arith.constant 0 : index
    %311 = vector.load %arg14[%c1_140, %c0_141, %c0_142] : memref<2x256x64xf32, #tpu.memory_space<vmem>>, vector<1x256x64xf32>
    %312 = vector.shape_cast %311 : vector<1x256x64xf32> to vector<256x64xf32>
    %cst_143 = arith.constant dense<0.000000e+00> : vector<16x64xf32>
    %313 = tpu.matmul %310, %312, %cst_143 {dimension_numbers = #tpu.dot_dimension_numbers<[1], [0], [0], [1], [0, 0, 1, 1], [], []>} : vector<16x256xf32>, vector<256x64xf32>, vector<16x64xf32> -> vector<16x64xf32>
    %314 = arith.addf %269, %313 : vector<16x64xf32>
    %c1_144 = arith.constant 1 : index
    %c0_145 = arith.constant 0 : index
    %c0_146 = arith.constant 0 : index
    %315 = vector.load %arg15[%c1_144, %c0_145, %c0_146] : memref<2x1x64xf32, #tpu.memory_space<vmem>>, vector<1x1x64xf32>
    %316 = vector.shape_cast %315 : vector<1x1x64xf32> to vector<1x64xf32>
    %317 = vector.broadcast %316 : vector<1x64xf32> to vector<16x64xf32>
    %318 = arith.addf %314, %317 : vector<16x64xf32>
    %c0_147 = arith.constant 0 : index
    %c0_148 = arith.constant 0 : index
    %319 = vector.load %arg16[%c0_147, %c0_148] : memref<1x64xf32, #tpu.memory_space<vmem>>, vector<1x64xf32>
    %c0_149 = arith.constant 0 : index
    %c0_150 = arith.constant 0 : index
    %320 = vector.load %arg17[%c0_149, %c0_150] : memref<1x64xf32, #tpu.memory_space<vmem>>, vector<1x64xf32>
    %cst_151 = arith.constant dense<0.000000e+00> : vector<16xf32>
    %321 = vector.multi_reduction <add>, %318, %cst_151 [1] : vector<16x64xf32> to vector<16xf32>
    %322 = vector.shape_cast %321 : vector<16xf32> to vector<16x1xf32>
    %cst_152 = arith.constant 6.400000e+01 : f32
    %323 = vector.broadcast %cst_152 : f32 to vector<16x1xf32>
    %324 = arith.divf %322, %323 : vector<16x1xf32>
    %325 = vector.broadcast %324 : vector<16x1xf32> to vector<16x64xf32>
    %326 = arith.subf %318, %325 : vector<16x64xf32>
    %327 = arith.mulf %326, %326 : vector<16x64xf32>
    %cst_153 = arith.constant dense<0.000000e+00> : vector<16xf32>
    %328 = vector.multi_reduction <add>, %327, %cst_153 [1] : vector<16x64xf32> to vector<16xf32>
    %329 = vector.shape_cast %328 : vector<16xf32> to vector<16x1xf32>
    %cst_154 = arith.constant 6.400000e+01 : f32
    %330 = vector.broadcast %cst_154 : f32 to vector<16x1xf32>
    %331 = arith.divf %329, %330 : vector<16x1xf32>
    %332 = vector.broadcast %324 : vector<16x1xf32> to vector<16x64xf32>
    %333 = arith.subf %318, %332 : vector<16x64xf32>
    %cst_155 = arith.constant 9.99999974E-6 : f32
    %334 = vector.broadcast %cst_155 : f32 to vector<16x1xf32>
    %335 = arith.addf %331, %334 : vector<16x1xf32>
    %336 = math.rsqrt %335 : vector<16x1xf32>
    %337 = vector.broadcast %336 : vector<16x1xf32> to vector<16x64xf32>
    %338 = arith.mulf %333, %337 : vector<16x64xf32>
    %339 = vector.broadcast %319 : vector<1x64xf32> to vector<16x64xf32>
    %340 = arith.mulf %338, %339 : vector<16x64xf32>
    %341 = vector.broadcast %320 : vector<1x64xf32> to vector<16x64xf32>
    %342 = arith.addf %340, %341 : vector<16x64xf32>
    %c0_156 = arith.constant 0 : index
    %c0_157 = arith.constant 0 : index
    %c0_158 = arith.constant 0 : index
    %343 = vector.load %arg18[%c0_156, %c0_157, %c0_158] : memref<1x16x64xf32, #tpu.memory_space<vmem>>, vector<1x16x64xf32>
    %344 = vector.shape_cast %343 : vector<1x16x64xf32> to vector<16x64xf32>
    %345 = vector.shape_cast %342 : vector<16x64xf32> to vector<1x16x64xf32>
    tpu.vector_store %arg18[%c0_156, %c0_157, %c0_158], %345 {strides = array<i32>} : memref<1x16x64xf32, #tpu.memory_space<vmem>>, vector<1x16x64xf32>,
    return
  }
  func.func @transform_0(%arg0: i32) -> (i32, i32, i32) {
    %c0_i32 = arith.constant 0 : i32
    %c0_i32_0 = arith.constant 0 : i32
    %c0_i32_1 = arith.constant 0 : i32
    return %arg0, %c0_i32, %c0_i32_0 : i32, i32, i32
  }
  func.func @transform_1(%arg0: i32) -> (i32, i32) {
    %c0_i32 = arith.constant 0 : i32
    %c0_i32_0 = arith.constant 0 : i32
    %c0_i32_1 = arith.constant 0 : i32
    return %c0_i32, %c0_i32_0 : i32, i32
  }
  func.func @transform_2(%arg0: i32) -> (i32, i32) {
    %c0_i32 = arith.constant 0 : i32
    %c0_i32_0 = arith.constant 0 : i32
    %c0_i32_1 = arith.constant 0 : i32
    return %c0_i32, %c0_i32_0 : i32, i32
  }
  func.func @transform_3(%arg0: i32) -> (i32, i32) {
    %c0_i32 = arith.constant 0 : i32
    %c0_i32_0 = arith.constant 0 : i32
    %c0_i32_1 = arith.constant 0 : i32
    return %c0_i32, %c0_i32_0 : i32, i32
  }
  func.func @transform_4(%arg0: i32) -> (i32, i32, i32) {
    %c0_i32 = arith.constant 0 : i32
    %c0_i32_0 = arith.constant 0 : i32
    %c0_i32_1 = arith.constant 0 : i32
    %c0_i32_2 = arith.constant 0 : i32
    return %c0_i32, %c0_i32_0, %c0_i32_1 : i32, i32, i32
  }
  func.func @transform_5(%arg0: i32) -> (i32, i32, i32) {
    %c0_i32 = arith.constant 0 : i32
    %c0_i32_0 = arith.constant 0 : i32
    %c0_i32_1 = arith.constant 0 : i32
    %c0_i32_2 = arith.constant 0 : i32
    return %c0_i32, %c0_i32_0, %c0_i32_1 : i32, i32, i32
  }
  func.func @transform_6(%arg0: i32) -> (i32, i32, i32) {
    %c0_i32 = arith.constant 0 : i32
    %c0_i32_0 = arith.constant 0 : i32
    %c0_i32_1 = arith.constant 0 : i32
    %c0_i32_2 = arith.constant 0 : i32
    return %c0_i32, %c0_i32_0, %c0_i32_1 : i32, i32, i32
  }
  func.func @transform_7(%arg0: i32) -> (i32, i32, i32) {
    %c0_i32 = arith.constant 0 : i32
    %c0_i32_0 = arith.constant 0 : i32
    %c0_i32_1 = arith.constant 0 : i32
    %c0_i32_2 = arith.constant 0 : i32
    return %c0_i32, %c0_i32_0, %c0_i32_1 : i32, i32, i32
  }
  func.func @transform_8(%arg0: i32) -> (i32, i32, i32) {
    %c0_i32 = arith.constant 0 : i32
    %c0_i32_0 = arith.constant 0 : i32
    %c0_i32_1 = arith.constant 0 : i32
    %c0_i32_2 = arith.constant 0 : i32
    return %c0_i32, %c0_i32_0, %c0_i32_1 : i32, i32, i32
  }
  func.func @transform_9(%arg0: i32) -> (i32, i32, i32) {
    %c0_i32 = arith.constant 0 : i32
    %c0_i32_0 = arith.constant 0 : i32
    %c0_i32_1 = arith.constant 0 : i32
    %c0_i32_2 = arith.constant 0 : i32
    return %c0_i32, %c0_i32_0, %c0_i32_1 : i32, i32, i32
  }
  func.func @transform_10(%arg0: i32) -> (i32, i32, i32) {
    %c0_i32 = arith.constant 0 : i32
    %c0_i32_0 = arith.constant 0 : i32
    %c0_i32_1 = arith.constant 0 : i32
    %c0_i32_2 = arith.constant 0 : i32
    return %c0_i32, %c0_i32_0, %c0_i32_1 : i32, i32, i32
  }
  func.func @transform_11(%arg0: i32) -> (i32, i32, i32) {
    %c0_i32 = arith.constant 0 : i32
    %c0_i32_0 = arith.constant 0 : i32
    %c0_i32_1 = arith.constant 0 : i32
    %c0_i32_2 = arith.constant 0 : i32
    return %c0_i32, %c0_i32_0, %c0_i32_1 : i32, i32, i32
  }
  func.func @transform_12(%arg0: i32) -> (i32, i32, i32) {
    %c0_i32 = arith.constant 0 : i32
    %c0_i32_0 = arith.constant 0 : i32
    %c0_i32_1 = arith.constant 0 : i32
    %c0_i32_2 = arith.constant 0 : i32
    return %c0_i32, %c0_i32_0, %c0_i32_1 : i32, i32, i32
  }
  func.func @transform_13(%arg0: i32) -> (i32, i32, i32) {
    %c0_i32 = arith.constant 0 : i32
    %c0_i32_0 = arith.constant 0 : i32
    %c0_i32_1 = arith.constant 0 : i32
    %c0_i32_2 = arith.constant 0 : i32
    return %c0_i32, %c0_i32_0, %c0_i32_1 : i32, i32, i32
  }
  func.func @transform_14(%arg0: i32) -> (i32, i32, i32) {
    %c0_i32 = arith.constant 0 : i32
    %c0_i32_0 = arith.constant 0 : i32
    %c0_i32_1 = arith.constant 0 : i32
    %c0_i32_2 = arith.constant 0 : i32
    return %c0_i32, %c0_i32_0, %c0_i32_1 : i32, i32, i32
  }
  func.func @transform_15(%arg0: i32) -> (i32, i32) {
    %c0_i32 = arith.constant 0 : i32
    %c0_i32_0 = arith.constant 0 : i32
    %c0_i32_1 = arith.constant 0 : i32
    return %c0_i32, %c0_i32_0 : i32, i32
  }
  func.func @transform_16(%arg0: i32) -> (i32, i32) {
    %c0_i32 = arith.constant 0 : i32
    %c0_i32_0 = arith.constant 0 : i32
    %c0_i32_1 = arith.constant 0 : i32
    return %c0_i32, %c0_i32_0 : i32, i32
  }
  func.func @transform_17(%arg0: i32) -> (i32, i32, i32) {
    %c0_i32 = arith.constant 0 : i32
    %c0_i32_0 = arith.constant 0 : i32
    %c0_i32_1 = arith.constant 0 : i32
    return %arg0, %c0_i32, %c0_i32_0 : i32, i32, i32
  }
}

</mosaic_0001>

<bundles_post_ra>
// kernel: encoder_forward.1
= control target key start
LH: loop header
LB: loop body
LE: loop exit
PB: predicated region body
PF: predicated region fallthrough
CT: control target
= control target key end

     0   :  { %s5671_s0 = inlined_call_operand.vmem [shape: f32[2,16,192], index: 0, kind: input, shape index: {}]   ;;  %s5672_s1 = inlined_call_operand.vmem [shape: f32[192,64], index: 1, kind: input, shape index: {}]   ;;  %s5673_s2 = inlined_call_operand.vmem [shape: f32[1,64], index: 2, kind: input, shape index: {}]   ;;  %s5674_s3 = inlined_call_operand.vmem [shape: f32[16,64], index: 3, kind: input, shape index: {}]   ;;  %s5675_s4 = inlined_call_operand.vmem [shape: f32[2,1,64], index: 4, kind: input, shape index: {}]   ;;  %s5676_s5 = inlined_call_operand.vmem [shape: f32[2,1,64], index: 5, kind: input, shape index: {}]   ;;  %s5677_s6 = inlined_call_operand.vmem [shape: f32[2,64,192], index: 6, kind: input, shape index: {}]   ;;  %s5678_s7 = inlined_call_operand.vmem [shape: f32[2,64,64], index: 7, kind: input, shape index: {}]   ;;  %s5679_s8 = inlined_call_operand.vmem [shape: f32[2,1,64], index: 8, kind: input, shape index: {}]   ;;  %s5680_s9 = inlined_call_operand.vmem [shape: f32[2,1,64], index: 9, kind: input, shape index: {}]   ;;  %s5681_s10 = inlined_call_operand.vmem [shape: f32[2,1,64], index: 10, kind: input, shape index: {}]   ;;  %s5682_s11 = inlined_call_operand.vmem [shape: f32[2,64,256], index: 11, kind: input, shape index: {}]   ;;  %s5683_s12 = inlined_call_operand.vmem [shape: f32[2,1,256], index: 12, kind: input, shape index: {}]   ;;  %s5684_s13 = inlined_call_operand.vmem [shape: f32[2,256,64], index: 13, kind: input, shape index: {}]   ;;  %s5685_s14 = inlined_call_operand.vmem [shape: f32[2,1,64], index: 14, kind: input, shape index: {}]   ;;  %s5686_s15 = inlined_call_operand.vmem [shape: f32[1,64], index: 15, kind: input, shape index: {}]   ;;  %s5687_s16 = inlined_call_operand.vmem [shape: f32[1,64], index: 16, kind: input, shape index: {}]   ;;  %s5688_s17 = inlined_call_operand.hbm [shape: f32[2,16,64], index: 17, kind: output, shape index: {}]  }
   0x1   :  { %5708 = sst [smem:[#allocation11_spill]] %s5671_s0 }
   0x2   :  { %5709 = sst [smem:[#allocation12_spill]] %s5672_s1 }
   0x3   :  { %5710 = sst [smem:[#allocation13_spill]] %s5688_s17 }
   0x4   :  { %22 = vsyncpa [#allocation3], 0 }
   0x5   :  { %24 = vsyncpa [#allocation3 + $0x1], 0  ;;  %s4675_s24 = smov 0   ;;  %s4677_s25 = smov 0  }
   0x6   :  { %s4679_s26 = smov 0   ;;  %s4681_s27 = smov 0  }
   0x7 LB: > { %5711 = sst [smem:[#allocation5_spill]] %s4559_s24  ;;  %s4696_s28 = sadd.s32 4294967295, %s4571_s27   ;;  %s4571_s27 = sphi %s4681_s27, %s5733_s27   ;;  %s4567_s26 = sphi %s4679_s26, %s5735_s26   ;;  %s4563_s25 = sphi %s4677_s25, %s5737_s25   ;;  %s4559_s24 = sphi %s4675_s24, %s5736_s24  }
   0x8   : > { %5712 = sst [smem:[#allocation6_spill]] %s4567_s26  ;;  %s3533_s29 = sadd.s32 4294967294, %s4571_s27  }
   0x9   : > { %5713 = sst [smem:[#allocation7_spill]] %s4571_s27  ;;  %s4700_s0 = sadd.s32 1, %s4571_s27  }
   0xa   : > { %5714 = sst [smem:[#allocation8_spill]] %s4700_s0  ;;  %s399_s30 = sadd.s32 1, %s4567_s26 }
   0xb   : > { %s396_s18 = ssub.s32 %s4571_s27, %s4700_s0  ;;  %p409_p0 = scmp.ne.s32.totalorder %s4567_s26, %s4563_s25 }
   0xc   : > { %p397_p1 = scmp.eq.s32.totalorder %s396_s18, 0  ;;  %p410_p2 = scmp.eq.s32.totalorder %s4696_s28, 1 }
   0xd   : > { %p415_p3 = scmp.ne.s32.totalorder %s4563_s25, %s4559_s24  ;;  %p416_p4 = scmp.eq.s32.totalorder %s3533_s29, 1 }
   0xe   : > { %s4711_s19 = scalar_select %p397_p1, %s4567_s26, %s399_s30  }
   0xf   : > { %p4713_p5 = por %p410_p2, %p409_p0  ;;  %p4717_p6 = por %p416_p4, %p415_p3 }
  0x10   : > { %5715 = sst [smem:[#allocation9_spill]] %s4711_s19  ;;  %p3536_p7 = scmp.ge.s32.totalorder %s4571_s27, 1 }
  0x11   : > { %s5717_s20 = scalar_select %p4717_p6, 1, 0 }
  0x12   : > { %p490_p8 = scmp.lt.s32.totalorder %s4571_s27, 3 }
  0x13   : > { %5718 = sst [smem:[#allocation10_spill]] %s5717_s20 }
  0x14   : > { %p491_p9 = pnand %p3536_p7, %p490_p8 }
  0x15   : > { %s5719_s23 = sld [smem:[#allocation12_spill]] (!%p491_p9)  ;;  %p542_p10 = scmp.lt.s32.totalorder (!%p491_p9), %s4696_s28, 1  ;;  %v4573_v3 = vmov (!%p491_p9), 0.0|0.0   ;;  %vm582_vm0 = vcmask (!%p491_p9), 523264   ;;  %v3540_v41 = vld [vmem:[%s5673_s2] ss:$0 sm:$0xff] (!%p491_p9) }
  0x16   : > { %494 = sbr.rel (%p491_p9) target bundleno = 7814 (0x1e86), region = 88  ;;  %4013 = vmatprep.subr.bf16.mxu0 (!%p491_p9), %v4573_v3  ;;  %s5720_s27 = sld [smem:[#allocation11_spill]] (!%p491_p9)  ;;  %v664_v43 = vld [vmem:[%s5674_s3] sm:$0xff] (!%p491_p9)  ;;  %v665_v48 = vld [vmem:[%s5674_s3 + $0x8] sm:$0xff] (!%p491_p9)  ;;  %vm820_vm1 = vcmask (!%p491_p9), 130048   ;;  %vm1637_vm3 = vcmask (!%p491_p9), 261120  }
  0x17   : > { %vm4905_vm2 = vmpackc.low (!%p491_p9), %vm820_vm1, %vm820_vm1  ;;  %s4577_s18 = smov (!%p491_p9), 48   ;;  %s5706_s26 = smov (!%p491_p9), 32   ;;  %vm1640_vm4 = vcmask (!%p491_p9), 392192  }
  0x18   : > { %s5699_s0 = smov (!%p491_p9), 16   ;;  %s5701_s20 = smov (!%p491_p9), 96  }
  0x19   : > { %s5697_s22 = smov (!%p491_p9), 80   ;;  %s5724_s30 = smov (!%p491_p9), 32  }
  0x1a   : > { %s5725_s24 = smov (!%p491_p9), 112  }
  0x1b   : > { %v551_v0 = vld [vmem:[%s5719_s23] sm:$0xff] (!%p491_p9)  ;;  %v552_v1 = vld [vmem:[%s5719_s23 + $0x8] sm:$0xff] (!%p491_p9)  ;;  %v553_v2 = vld [vmem:[%s5719_s23 + $0x10] sm:$0xff] (!%p491_p9) }
  0x1c   : > { %v4014_v4 = vpack.c.bf16 (!%p491_p9), %v552_v1, %v551_v0  ;;  %v554_v5 = vld [vmem:[%s5719_s23 + $0x18] sm:$0xff] (!%p491_p9)  ;;  %v555_v7 = vld [vmem:[%s5719_s23 + $0x20] sm:$0xff] (!%p491_p9)  ;;  %v556_v8 = vld [vmem:[%s5719_s23 + $0x28] sm:$0xff] (!%p491_p9) }
  0x1d   : > { %s543_s21 = scalar_select %p542_p10, %s4696_s28, 1  ;;  %v4017_v6 = vpack.c.bf16 %v554_v5, %v553_v2  ;;  %v4020_v9 = vpack.c.bf16 %v556_v8, %v555_v7  ;;  %v557_v10 = vld [vmem:[%s5719_s23 + $0x30] sm:$0xff]  ;;  %v558_v11 = vld [vmem:[%s5719_s23 + $0x38] sm:$0xff]  ;;  %v559_v14 = vld [vmem:[%s5719_s23 + $0x40] sm:$0xff] }
  0x1e   : > { %4015 = vmatpush1.bf16.msra.mxu0 %v4014_v4  ;;  %v4023_v13 = vpack.c.bf16 %v558_v11, %v557_v10  ;;  %v560_v15 = vld [vmem:[%s5719_s23 + $0x48] sm:$0xff]  ;;  %v561_v17 = vld [vmem:[%s5719_s23 + $0x50] sm:$0xff]  ;;  %v562_v18 = vld [vmem:[%s5719_s23 + $0x58] sm:$0xff] }
  0x1f   : > { %4016 = vmatprep.subr.bf16.mxu0 %v4573_v3  ;;  %s3701_s19 = sshll.u32 %s543_s21, 5  ;;  %v4026_v16 = vpack.c.bf16 %v560_v15, %v559_v14  ;;  %v4029_v19 = vpack.c.bf16 %v562_v18, %v561_v17  ;;  %v563_v20 = vld [vmem:[%s5719_s23 + $0x60] sm:$0xff]  ;;  %v564_v21 = vld [vmem:[%s5719_s23 + $0x68] sm:$0xff]  ;;  %v565_v23 = vld [vmem:[%s5719_s23 + $0x70] sm:$0xff]  ;;  %s5728_s21 = smov 80  }
  0x20   : > { %s4746_s17 = scalar_lea.vmem %s5720_s27, %s3701_s19  ;;  %v4032_v22 = vpack.c.bf16 %v564_v21, %v563_v20  ;;  %v566_v24 = vld [vmem:[%s5719_s23 + $0x78] sm:$0xff]  ;;  %v567_v26 = vld [vmem:[%s5719_s23 + $0x80] sm:$0xff]  ;;  %v568_v27 = vld [vmem:[%s5719_s23 + $0x88] sm:$0xff]  ;;  %s5703_s19 = smov 112  }
  0x21   : > { %v548_v12 = vld [vmem:[%s4746_s17 + $0x8] sm:$0xff]  ;;  %v4035_v25 = vpack.c.bf16 %v566_v24, %v565_v23  ;;  %v4038_v28 = vpack.c.bf16 %v568_v27, %v567_v26  ;;  %v569_v29 = vld [vmem:[%s5719_s23 + $0x90] sm:$0xff]  ;;  %v570_v30 = vld [vmem:[%s5719_s23 + $0x98] sm:$0xff]  ;;  %v4574_v24 = vmov 0.0   ;;  %s5726_s27 = smov 96  }
  0x22   : > { %4018 = vmatpush1.bf16.msra.mxu0 %v4017_v6  ;;  %3541 = vmatprep.mubr.msk.f32.mxu0 %vm582_vm0, %v548_v12  ;;  %v4041_v31 = vpack.c.bf16 %v570_v30, %v569_v29  ;;  %v571_v32 = vld [vmem:[%s5719_s23 + $0xa0] sm:$0xff]  ;;  %v572_v33 = vld [vmem:[%s5719_s23 + $0xa8] sm:$0xff]  ;;  %v573_v35 = vld [vmem:[%s5719_s23 + $0xb0] sm:$0xff] }
  0x23   : > { %4019 = vmatprep.subr.bf16.mxu0 %v4573_v3  ;;  %v4044_v34 = vpack.c.bf16 %v572_v33, %v571_v32  ;;  %v574_v36 = vld [vmem:[%s5719_s23 + $0xb8] sm:$0xff]  ;;  %v547_v38 = vld [vmem:[%s4746_s17] sm:$0xff]  ;;  %v549_v40 = vld [vmem:[%s4746_s17 + $0x10] sm:$0xff] }
  0x24   : > { %v4047_v37 = vpack.c.bf16 %v574_v36, %v573_v35  ;;  %v550_v39 = vld [vmem:[%s4746_s17 + $0x18] sm:$0xff]  ;;  %v714_v0 = vld [vmem:[%s5677_s6 + $0x8] sm:$0xff]  ;;  %v715_v4 = vld [vmem:[%s5677_s6 + $0x10] sm:$0xff]  ;;  %s5705_s17 = smov 64  }
  0x25   : > { %v716_v1 = vld [vmem:[%s5677_s6 + $0x18] sm:$0xff]  ;;  %v718_v6 = vld [vmem:[%s5677_s6 + $0x28] sm:$0xff]  ;;  %v719_v10 = vld [vmem:[%s5677_s6 + $0x30] sm:$0xff] }
  0x26   : > { %4021 = vmatpush1.bf16.msra.mxu0 %v4020_v9  ;;  %v4049_v2 = vpack.c.bf16 %v716_v1, %v714_v0  ;;  %v720_v7 = vld [vmem:[%s5677_s6 + $0x38] sm:$0xff]  ;;  %v717_v9 = vld [vmem:[%s5677_s6 + $0x20] sm:$0xff]  ;;  %v722_v12 = vld [vmem:[%s5677_s6 + $0x48] sm:$0xff] }
  0x27   : > { %4022 = vmatprep.subr.bf16.mxu0 %v4573_v3  ;;  %v4053_v8 = vpack.c.bf16 %v720_v7, %v718_v6  ;;  %v4055_v11 = vpack.c.bf16 %v719_v10, %v717_v9  ;;  %v721_v15 = vld [vmem:[%s5677_s6 + $0x40] sm:$0xff]  ;;  %v726_v18 = vld [vmem:[%s5677_s6 + $0x68] sm:$0xff] }
  0x28   : > { %v725_v21 = vld [vmem:[%s5677_s6 + $0x60] sm:$0xff] }
  0x29   : > { %v3543_v32 = vld [vmem:[%s5675_s4] ss:$0 sm:$0xff] }
  0x2a   : > { %4024 = vmatpush1.bf16.msra.mxu0 %v4023_v13  ;;  %v724_v13 = vld [vmem:[%s5677_s6 + $0x58] sm:$0xff] }
  0x2b   : > { %4025 = vmatprep.subr.bf16.mxu0 %v4573_v3  ;;  %v4057_v14 = vpack.c.bf16 %v724_v13, %v722_v12 }
  0x2e   : > { %4027 = vmatpush1.bf16.msra.mxu0 %v4026_v16  ;;  %v723_v16 = vld [vmem:[%s5677_s6 + $0x50] sm:$0xff] }
  0x2f   : > { %4028 = vmatprep.subr.bf16.mxu0 %v4573_v3  ;;  %v4059_v17 = vpack.c.bf16 %v723_v16, %v721_v15 }
  0x32   : > { %4030 = vmatpush1.bf16.msra.mxu0 %v4029_v19  ;;  %v728_v19 = vld [vmem:[%s5677_s6 + $0x78] sm:$0xff] }
  0x33   : > { %4031 = vmatprep.subr.bf16.mxu0 %v4573_v3  ;;  %v4061_v20 = vpack.c.bf16 %v728_v19, %v726_v18 }
  0x36   : > { %4033 = vmatpush1.bf16.msra.mxu0 %v4032_v22  ;;  %v727_v22 = vld [vmem:[%s5677_s6 + $0x70] sm:$0xff] }
  0x37   : > { %4034 = vmatprep.subr.bf16.mxu0 %v4573_v3  ;;  %v4063_v23 = vpack.c.bf16 %v727_v22, %v725_v21 }
  0x3a   : > { %4036 = vmatpush1.bf16.msra.mxu0 %v4035_v25 }
  0x3b   : > { %4037 = vmatprep.subr.bf16.mxu0 %v4573_v3 }
  0x3e   : > { %4039 = vmatpush1.bf16.msra.mxu0 %v4038_v28 }
  0x3f   : > { %4040 = vmatprep.subr.bf16.mxu0 %v4573_v3 }
  0x42   : > { %4042 = vmatpush1.bf16.msra.mxu0 %v4041_v31 }
  0x43   : > { %4043 = vmatprep.subr.bf16.mxu0 %v4573_v3 }
  0x46   : > { %4045 = vmatpush1.bf16.msra.mxu0 %v4044_v34  ;;  %v3544_v34 = vld [vmem:[%s5676_s5] ss:$0 sm:$0xff] }
  0x47   : > { %4046 = vmatprep.subr.bf16.mxu0 %v4573_v3  ;;  %v713_v3 = vld [vmem:[%s5677_s6] sm:$0xff] }
  0x48   : > { %v4051_v5 = vpack.c.bf16 %v715_v4, %v713_v3 }
  0x4a   : > { %4048 = vmatpush1.bf16.msra.mxu0 %v4047_v37 }
  0x4b   : > { %4050 = vmatprep.subr.bf16.mxu0 %v4049_v2 }
  0x4d   : > { %654 = vmatmul.mubr.f32.vlgmr.msra.gmra.mrb[0].mxu0 %v547_v38 }
  0x4e   : > { %3542 = vmatprep.mubr.msk.f32.mxu0 %vm582_vm0, %v550_v39  ;;  %4052 = vmatpush1.bf16.msra.mxu0 %v4051_v5 }
  0x4f   : > { %4054 = vmatprep.subr.bf16.mxu0 %v4053_v8 }
  0x51   : > { %659 = vmatmul.mubr.f32.gmra.mrb[2].mxu0 %v549_v40 }
  0x52   : > { %4056 = vmatpush1.bf16.msra.mxu0 %v4055_v11  ;;  %799 = vmatprep.mubr.f32.mxu0 %v4574_v24 }
  0x53   : > { %4058 = vmatprep.subr.bf16.mxu0 %v4057_v14 }
  0x56   : > { %4060 = vmatpush1.bf16.msra.mxu0 %v4059_v17 }
  0x57   : > { %4062 = vmatprep.subr.bf16.mxu0 %v4061_v20 }
  0x5a   : > { %4064 = vmatpush1.bf16.msra.mxu0 %v4063_v23 }
 0x120   : > { %v655_v42 = vpop.f32.mrb[0].mxu0 }
 0x121   : > { %v656_v44 = vadd.f32 %v3540_v41, %v655_v42  ;;  %v657_v45 = vpop.f32.mrb[1].mxu0 }
 0x123   : > { %v4814_v46 = vadd.f32 %v664_v43, %v656_v44 }
 0x124   : > { %v660_v47 = vpop.f32.mrb[2].mxu0 }
 0x125   : > { %v661_v49 = vadd.f32 %v3540_v41, %v660_v47  ;;  %v662_v50 = vpop.f32.mrb[3].mxu0  ;;  %v670_v51 = vsel %vm582_vm0, %v4814_v46, 0.0 }
 0x126   : > { %671 = vadd.xlane.f32.xlu0 %v670_v51 }
 0x127   : > { %v4821_v52 = vadd.f32 %v665_v48, %v661_v49 }
 0x129   : > { %v673_v53 = vsel %vm582_vm0, %v4821_v52, 0.0 }
 0x12a   : > { %674 = vadd.xlane.f32.xlu0 %v673_v53 }
 0x1b3   : > { %v672_v54 = vpop.xlane.xlu0 %671 }
 0x1b4   : > { %v677_v55 = vmul.f32 0.015625, %v672_v54 }
 0x1b6   : > { %v679_v56 = vsub.f32 %v4814_v46, %v677_v55 }
 0x1b7   : > { %v675_v57 = vpop.xlane.xlu0 %674 }
 0x1b8   : > { %v678_v58 = vmul.f32 0.015625, %v675_v57  ;;  %v681_v59 = vmul.f32 %v679_v56, %v679_v56 }
 0x1ba   : > { %v680_v60 = vsub.f32 %v4821_v52, %v678_v58  ;;  %v683_v61 = vsel %vm582_vm0, %v681_v59, 0.0 }
 0x1bb   : > { %684 = vadd.xlane.f32.xlu1 %v683_v61 }
 0x1bc   : > { %v682_v62 = vmul.f32 %v680_v60, %v680_v60 }
 0x1be   : > { %v686_v63 = vsel %vm582_vm0, %v682_v62, 0.0 }
 0x1bf   : > { %687 = vadd.xlane.f32.xlu1 %v686_v63 }
 0x248   : > { %v685_v25 = vpop.xlane.xlu1 %684 }
 0x249   : > { %v689_v26 = vmul.f32 0.015625, %v685_v25 }
 0x24b   : > { %v691_v27 = vadd.f32 1e-05, %v689_v26 }
 0x24c   : > { %v688_v28 = vpop.xlane.xlu1 %687 }
 0x24d   : > { %4409 = vrsqrt.f32 %v691_v27  ;;  %v690_v29 = vmul.f32 0.015625, %v688_v28 }
 0x24f   : > { %v692_v30 = vadd.f32 1e-05, %v690_v29 }
 0x251   : > { %4411 = vrsqrt.f32 %v692_v30 }
 0x257   : > { %v4410_v31 = vpop.eup %4409 }
 0x258   : > { %v695_v33 = vmul.f32 %v4410_v31, %v679_v56 }
 0x25a   : > { %v703_v35 = vmul.f32 %v3543_v32, %v695_v33 }
 0x25b   : > { %v4412_v36 = vpop.eup %4411 }
 0x25c   : > { %v711_v37 = vadd.f32 %v3544_v34, %v703_v35  ;;  %v696_v38 = vmul.f32 %v4412_v36, %v680_v60 }
 0x25e   : > { %3545 = vmatmul.mubr.msk.f32.vlgmr.msra.gmra.mrb[4].mxu0 %vm582_vm0, %v711_v37  ;;  %v704_v39 = vmul.f32 %v3543_v32, %v696_v38 }
 0x25f   : > { %805 = vmatprep.mubr.f32.mxu0 %v4574_v24 }
 0x260   : > { %v712_v40 = vadd.f32 %v3544_v34, %v704_v39 }
 0x262   : > { %3546 = vmatmul.mubr.msk.f32.gmra.mrb[6].mxu0 %vm582_vm0, %v712_v40 }
 0x331   : > { %v801_v41 = vpop.f32.mrb[4].mxu0 }
 0x332   : > { %v803_v42 = vpop.f32.mrb[5].mxu0  ;;  %v4887_v43 = vmul.f32 0.25, %v801_v41 }
 0x334   : > { %3867 = vmatprep.mubr.msk.f32.mxu1 %vm820_vm1, %v4887_v43 }
 0x335   : > { %v807_v44 = vpop.f32.mrb[6].mxu0 }
 0x336   : > { %v809_v45 = vpop.f32.mrb[7].mxu0  ;;  %v4891_v47 = vpack.i.bf16 %v807_v44, %v801_v41  ;;  %v4899_v50 = vmul.f32 0.25, %v807_v44 }
 0x337   : > { %v4071_v48 = vpack.c.bf16 %v809_v45, %v803_v42  ;;  %v4893_v49 = vpack.i.bf16 %v809_v45, %v803_v42 }
 0x338   : > { %4340 = vrot.lane.b32.xlu0 %v4891_v47, %s5705_s17  ;;  %s5729_s17 = sld [smem:[#allocation13_spill]] }
 0x33c   : > { %1009 = vrot.lane.b32.xlu0 %v4887_v43, %s5703_s19 }
 0x340   : > { %1011 = vrot.lane.b32.xlu0 %v4899_v50, %s5703_s19 }
 0x3aa   : > { %v4341_v51 = vpop.permute.xlu0 %4340 }
 0x3ab   : > { %v4343_v53 = vunpack.i.h.bf16 %v4341_v51  ;;  %v4342_v54 = vunpack.i.l.bf16 %v4341_v51 }
 0x3ad   : > { %v4065_v56 = vpack.c.bf16 %v4343_v53, %v4342_v54 }
 0x3ae   : > { %v1010_v17 = vpop.permute.xlu0 %1009 }
 0x3af   : > { %4067 = vmatprep.subr.msk.bf16.mxu1 %vm4905_vm2, %v4065_v56 }
 0x3b0   : > { %4070 = vmatpush3.bf16.xpose.msk.msra.mxu1 %vm4905_vm2, %v4065_v56 }
 0x3b1   : > { %4072 = vmatprep.subr.bf16.mxu1 %v4071_v48 }
 0x3b2   : > { %v1012_v18 = vpop.permute.xlu0 %1011 }
 0x3b7   : > { %3868 = vmatmul.mubr.msk.f32.vlgmr.msra.gmra.mrb[0].mxu1 %vm820_vm1, %v4899_v50 }
 0x3b8   : > { %4074 = vmatpush3.bf16.msra.mxu1 %v4071_v48 }
 0x48a   : > { %v3869_v57 = vpop.f32.mrb[0].mxu1 }
 0x48b   : > { %v897_v58 = vpop.f32.mrb[1].mxu1  ;;  %v909_v60 = vsel %vm820_vm1, %v3869_v57, -inf }
 0x48c   : > { %v906_v59 = vsel %vm820_vm1, %v897_v58, -inf }
 0x48d   : > { %907 = vmax.xlane.f32.xlu1 %v906_v59 }
 0x491   : > { %910 = vmax.xlane.f32.xlu1 %v909_v60 }
 0x51a   : > { %v908_v61 = vpop.xlane.xlu1 %907 }
 0x51b   : > { %v912_v62 = vsub.f32 %v897_v58, %v908_v61 }
 0x51d   : > { %v914_v1 = vmul.f32 1.442695, %v912_v62 }
 0x51e   : > { %v911_v63 = vpop.xlane.xlu1 %910 }
 0x51f   : > { %v913_v0 = vsub.f32 %v3869_v57, %v911_v63 }
 0x521   : > { %v916_v2 = vmul.f32 1.442695, %v913_v0 }
 0x523   : > { %4413 = vpow2.f32 %v916_v2 }
 0x524   : > { %4415 = vpow2.f32 %v914_v1 }
 0x52d   : > { %v4414_v3 = vpop.eup %4413 }
 0x52e   : > { %v921_v4 = vsel %vm820_vm1, %v4414_v3, 0.0  ;;  %v4416_v5 = vpop.eup %4415 }
 0x52f   : > { %922 = vadd.xlane.f32.xlu1 %v921_v4  ;;  %v918_v6 = vsel %vm820_vm1, %v4416_v5, 0.0 }
 0x533   : > { %919 = vadd.xlane.f32.xlu1 %v918_v6 }
 0x544   : > { %4345 = vrot.lane.b32.xlu1 %v4891_v47, %s4577_s18 }
 0x5bc   : > { %v923_v7 = vpop.xlane.xlu1 %922 }
 0x5bd   : > { %4417 = vrcp.f32 %v923_v7 }
 0x5c0   : > { %v920_v8 = vpop.xlane.xlu1 %919 }
 0x5c1   : > { %4419 = vrcp.f32 %v920_v8 }
 0x5c4   : > { %v4346_v9 = vpop.permute.xlu1 %4345 }
 0x5c5   : > { %v4348_v10 = vunpack.i.h.bf16 %v4346_v9  ;;  %v4347_v11 = vunpack.i.l.bf16 %v4346_v9 }
 0x5c7   : > { %v4075_v12 = vpack.c.bf16 %v4348_v10, %v4347_v11  ;;  %v4418_v13 = vpop.eup %4417 }
 0x5c8   : > { %v927_v16 = vmul.f32 %v4418_v13, %v4414_v3 }
 0x5c9   : > { %4077 = vmatprep.subr.msk.bf16.mxu1 %vm4905_vm2, %v4075_v12 }
 0x5cb   : > { %v4420_v14 = vpop.eup %4419 }
 0x5cc   : > { %v926_v15 = vmul.f32 %v4420_v14, %v4416_v5 }
 0x5ce   : > { %3874 = vmatprep.mubr.msk.f32.mxu1 %vm820_vm1, %v926_v15 }
 0x5cf   : > { %3875 = vmatmul.mubr.msk.f32.vlgmr.msra.gmra.mrb[2].mxu1 %vm820_vm1, %v927_v16 }
 0x5d0   : > { %4080 = vmatpush3.bf16.xpose.msk.msra.mxu1 %vm4905_vm2, %v4075_v12  ;;  %3881 = vmatprep.mubr.msk.f32.mxu1 %vm820_vm1, %v1010_v17 }
 0x5d7   : > { %3882 = vmatmul.mubr.msk.f32.vlgmr.msra.gmra.mrb[4].mxu1 %vm820_vm1, %v1012_v18 }
 0x6a2   : > { %v4929_v19 = vpop.f32.mrb[2].mxu1 }
 0x6a3   : > { %v4931_v20 = vpop.f32.mrb[3].mxu1 }
 0x6aa   : > { %v3883_v21 = vpop.f32.mrb[4].mxu1 }
 0x6ab   : > { %v1091_v22 = vpop.f32.mrb[5].mxu1  ;;  %v1103_v23 = vsel %vm820_vm1, %v3883_v21, -inf }
 0x6ac   : > { %1104 = vmax.xlane.f32.xlu1 %v1103_v23  ;;  %v1100_v25 = vsel %vm820_vm1, %v1091_v22, -inf }
 0x6ad   : > { %1101 = vmax.xlane.f32.xlu0 %v1100_v25 }
 0x6bd   : > { %4355 = vrot.lane.b32.xlu1 %v4891_v47, %s5706_s26 }
 0x6c1   : > { %4360 = vrot.lane.b32.xlu1 %v4891_v47, %s5699_s0 }
 0x6c5   : > { %1211 = vrot.lane.b32.xlu1 %v4887_v43, %s5701_s20 }
 0x6c9   : > { %1411 = vrot.lane.b32.xlu1 %v4887_v43, %s5697_s22 }
 0x739   : > { %v1105_v26 = vpop.xlane.xlu1 %1104 }
 0x73a   : > { %v1107_v27 = vsub.f32 %v3883_v21, %v1105_v26  ;;  %v1102_v28 = vpop.xlane.xlu0 %1101 }
 0x73b   : > { %v1106_v29 = vsub.f32 %v1091_v22, %v1102_v28 }
 0x73c   : > { %v1110_v30 = vmul.f32 1.442695, %v1107_v27 }
 0x73d   : > { %v1108_v31 = vmul.f32 1.442695, %v1106_v29  ;;  %v4356_v32 = vpop.permute.xlu1 %4355 }
 0x73e   : > { %4421 = vpow2.f32 %v1110_v30  ;;  %v4358_v47 = vunpack.i.h.bf16 %v4356_v32  ;;  %v4357_v48 = vunpack.i.l.bf16 %v4356_v32 }
 0x73f   : > { %4423 = vpow2.f32 %v1108_v31 }
 0x740   : > { %v4085_v57 = vpack.c.bf16 %v4358_v47, %v4357_v48 }
 0x741   : > { %v4361_v33 = vpop.permute.xlu1 %4360 }
 0x742   : > { %v4363_v34 = vunpack.i.h.bf16 %v4361_v33  ;;  %v4362_v35 = vunpack.i.l.bf16 %v4361_v33 }
 0x744   : > { %v4095_v36 = vpack.c.bf16 %v4363_v34, %v4362_v35 }
 0x745   : > { %v1212_v37 = vpop.permute.xlu1 %1211 }
 0x746   : > { %4097 = vmatprep.subr.msk.bf16.mxu0 %vm4905_vm2, %v4095_v36 }
 0x747   : > { %4100 = vmatpush3.bf16.xpose.msk.msra.mxu0 %vm4905_vm2, %v4095_v36 }
 0x748   : > { %v4422_v38 = vpop.eup %4421 }
 0x749   : > { %v1412_v39 = vpop.permute.xlu1 %1411  ;;  %v1115_v40 = vsel %vm820_vm1, %v4422_v38, 0.0  ;;  %v4424_v41 = vpop.eup %4423 }
 0x74a   : > { %3909 = vmatprep.mubr.msk.f32.mxu0 %vm820_vm1, %v1412_v39  ;;  %1116 = vadd.xlane.f32.xlu0 %v1115_v40  ;;  %v1112_v42 = vsel %vm820_vm1, %v4424_v41, 0.0 }
 0x74e   : > { %1113 = vadd.xlane.f32.xlu0 %v1112_v42 }
 0x764   : > { %4350 = vrot.lane.b32.xlu0 %v4893_v49, %s5703_s19  ;;  %s539_s19 = sand.u32 1, %s4563_s25  }
 0x768   : > { %1213 = vrot.lane.b32.xlu0 %v4899_v50, %s5701_s20 }
 0x76c   : > { %1413 = vrot.lane.b32.xlu0 %v4899_v50, %s5697_s22 }
 0x7d7   : > { %v1117_v43 = vpop.xlane.xlu0 %1116 }
 0x7d8   : > { %4425 = vrcp.f32 %v1117_v43 }
 0x7db   : > { %v1114_v44 = vpop.xlane.xlu0 %1113 }
 0x7dc   : > { %4427 = vrcp.f32 %v1114_v44 }
 0x7df   : > { %v4351_v45 = vpop.permute.xlu0 %4350 }
 0x7e0   : > { %v4353_v51 = vunpack.i.h.bf16 %v4351_v45  ;;  %v4352_v53 = vunpack.i.l.bf16 %v4351_v45 }
 0x7e2   : > { %v4081_v54 = vpack.c.bf16 %v4353_v51, %v4352_v53  ;;  %v4426_v58 = vpop.eup %4425 }
 0x7e3   : > { %v1214_v56 = vpop.permute.xlu0 %1213  ;;  %v1121_v61 = vmul.f32 %v4426_v58, %v4422_v38 }
 0x7e4   : > { %4082 = vmatprep.subr.bf16.mxu1 %v4081_v54 }
 0x7e5   : > { %4084 = vmatpush3.bf16.msra.mxu1 %v4081_v54  ;;  %v1643_v54 = vld [vmem:[%s5678_s7] sm:$0xff] }
 0x7e6   : > { %v4428_v59 = vpop.eup %4427  ;;  %4087 = vmatprep.subr.msk.bf16.mxu1 %vm4905_vm2, %v4085_v57 }
 0x7e7   : > { %v1414_v50 = vpop.permute.xlu0 %1413  ;;  %v1120_v60 = vmul.f32 %v4428_v59, %v4424_v41  ;;  %v1646_v59 = vld [vmem:[%s5678_s7 + $0x18] sm:$0xff] }
 0x7e8   : > { %3910 = vmatmul.mubr.msk.f32.vlgmr.msra.gmra.mrb[8].mxu0 %vm820_vm1, %v1414_v50 }
 0x7e9   : > { %3888 = vmatprep.mubr.msk.f32.mxu1 %vm820_vm1, %v1120_v60  ;;  %v1647_v60 = vld [vmem:[%s5678_s7 + $0x20] sm:$0xff] }
 0x7ea   : > { %3889 = vmatmul.mubr.msk.f32.vlgmr.msra.gmra.mrb[6].mxu1 %vm820_vm1, %v1121_v61  ;;  %v1648_v61 = vld [vmem:[%s5678_s7 + $0x28] sm:$0xff] }
 0x7eb   : > { %3895 = vmatprep.mubr.msk.f32.mxu1 %vm820_vm1, %v1212_v37 }
 0x7ee   : > { %4090 = vmatpush3.bf16.xpose.msk.msra.mxu1 %vm4905_vm2, %v4085_v57  ;;  %v1645_v57 = vld [vmem:[%s5678_s7 + $0x10] sm:$0xff] }
 0x7ef   : > { %v4109_v50 = vpack.c.bf16 %v1646_v59, %v1645_v57  ;;  %v1802_v59 = vld [vmem:[%s5682_s11 + $0x78] sm:$0xff] }
 0x7f5   : > { %3896 = vmatmul.mubr.msk.f32.vlgmr.msra.gmra.mrb[8].mxu1 %vm820_vm1, %v1214_v56  ;;  %v1644_v56 = vld [vmem:[%s5678_s7 + $0x8] sm:$0xff] }
 0x7f6   : > { %v4105_v58 = vpack.c.bf16 %v1644_v56, %v1643_v54  ;;  %v1795_v54 = vld [vmem:[%s5682_s11 + $0x40] sm:$0xff]  ;;  %v1797_v56 = vld [vmem:[%s5682_s11 + $0x50] sm:$0xff] }
 0x7f7   : > { %v4131_v57 = vpack.c.bf16 %v1797_v56, %v1795_v54  ;;  %v1946_v56 = vld [vmem:[%s5684_s13 + $0xe0] sm:$0xff] }
 0x7f8   : > { %4106 = vmatprep.subr.bf16.mxu0 %v4105_v58 }
 0x7f9   : > { %4108 = vmatpush3.bf16.msra.mxu0 %v4105_v58  ;;  %v1800_v58 = vld [vmem:[%s5682_s11 + $0x68] sm:$0xff] }
 0x7fa   : > { %4110 = vmatprep.subr.bf16.mxu0 %v4109_v50 }
 0x7fd   : > { %4112 = vmatpush3.bf16.msra.mxu0 %v4109_v50  ;;  %v1799_v50 = vld [vmem:[%s5682_s11 + $0x60] sm:$0xff] }
 0x8bb   : > { %v3911_v62 = vpop.f32.mrb[8].mxu0 }
 0x8bc   : > { %v1493_v63 = vpop.f32.mrb[9].mxu0  ;;  %v1505_v7 = vsel %vm820_vm1, %v3911_v62, -inf }
 0x8bd   : > { %v3890_v0 = vpop.f32.mrb[6].mxu1  ;;  %v1502_v6 = vsel %vm820_vm1, %v1493_v63, -inf }
 0x8be   : > { %v1202_v1 = vpop.f32.mrb[7].mxu1 }
 0x8c8   : > { %v3897_v2 = vpop.f32.mrb[8].mxu1 }
 0x8c9   : > { %v1293_v3 = vpop.f32.mrb[9].mxu1  ;;  %v1305_v4 = vsel %vm820_vm1, %v3897_v2, -inf }
 0x8ca   : > { %1306 = vmax.xlane.f32.xlu0 %v1305_v4  ;;  %v1302_v5 = vsel %vm820_vm1, %v1293_v3, -inf }
 0x8cb   : > { %1303 = vmax.xlane.f32.xlu1 %v1302_v5 }
 0x8ce   : > { %1503 = vmax.xlane.f32.xlu0 %v1502_v6 }
 0x8d2   : > { %1506 = vmax.xlane.f32.xlu0 %v1505_v7 }
 0x957   : > { %v1307_v8 = vpop.xlane.xlu0 %1306 }
 0x958   : > { %v1304_v9 = vpop.xlane.xlu1 %1303  ;;  %v1309_v13 = vsub.f32 %v3897_v2, %v1307_v8 }
 0x959   : > { %v1308_v10 = vsub.f32 %v1293_v3, %v1304_v9 }
 0x95a   : > { %v1312_v18 = vmul.f32 1.442695, %v1309_v13 }
 0x95b   : > { %v1504_v11 = vpop.xlane.xlu0 %1503  ;;  %v1310_v14 = vmul.f32 1.442695, %v1308_v10 }
 0x95c   : > { %v1508_v12 = vsub.f32 %v1493_v63, %v1504_v11  ;;  %v1649_v63 = vld [vmem:[%s5678_s7 + $0x30] sm:$0xff] }
 0x95e   : > { %v1510_v15 = vmul.f32 1.442695, %v1508_v12 }
 0x95f   : > { %v1507_v16 = vpop.xlane.xlu0 %1506 }
 0x960   : > { %4429 = vpow2.f32 %v1510_v15  ;;  %v1509_v17 = vsub.f32 %v3911_v62, %v1507_v16  ;;  %v4113_v62 = vpack.c.bf16 %v1648_v61, %v1647_v60  ;;  %v4133_v60 = vpack.c.bf16 %v1802_v59, %v1800_v58  ;;  %v1801_v61 = vld [vmem:[%s5682_s11 + $0x70] sm:$0xff]  ;;  %v1930_v59 = vld [vmem:[%s5684_s13 + $0x60] sm:$0xff] }
 0x961   : > { %4431 = vpow2.f32 %v1310_v14 }
 0x962   : > { %v1512_v21 = vmul.f32 1.442695, %v1509_v17  ;;  %4114 = vmatprep.subr.bf16.mxu0 %v4113_v62 }
 0x963   : > { %4116 = vmatpush3.bf16.msra.mxu0 %v4113_v62  ;;  %v4135_v62 = vpack.c.bf16 %v1801_v61, %v1799_v50  ;;  %v1931_v50 = vld [vmem:[%s5684_s13 + $0x68] sm:$0xff]  ;;  %v1948_v61 = vld [vmem:[%s5684_s13 + $0xf0] sm:$0xff] }
 0x964   : > { %4433 = vpow2.f32 %v1512_v21 }
 0x965   : > { %4435 = vpow2.f32 %v1312_v18 }
 0x96a   : > { %v4430_v22 = vpop.eup %4429 }
 0x96b   : > { %v1514_v23 = vsel %vm820_vm1, %v4430_v22, 0.0  ;;  %v4432_v25 = vpop.eup %4431 }
 0x96c   : > { %1515 = vadd.xlane.f32.xlu1 %v1514_v23  ;;  %v1314_v28 = vsel %vm820_vm1, %v4432_v25, 0.0 }
 0x96e   : > { %v4434_v26 = vpop.eup %4433 }
 0x96f   : > { %v1517_v27 = vsel %vm820_vm1, %v4434_v26, 0.0  ;;  %v4436_v29 = vpop.eup %4435 }
 0x970   : > { %1518 = vadd.xlane.f32.xlu0 %v1517_v27  ;;  %1315 = vadd.xlane.f32.xlu1 %v1314_v28  ;;  %v1317_v30 = vsel %vm820_vm1, %v4436_v29, 0.0 }
 0x974   : > { %1318 = vadd.xlane.f32.xlu0 %v1317_v30 }
 0x981   : > { %4365 = vrot.lane.b32.xlu1 %v4893_v49, %s5701_s20 }
 0x985   : > { %1613 = vrot.lane.b32.xlu1 %v1202_v1, %s5699_s0 }
 0x989   : > { %1615 = vrot.lane.b32.xlu1 %v3890_v0, %s5699_s0  ;;  %v1650_v0 = vld [vmem:[%s5678_s7 + $0x38] sm:$0xff] }
 0x98a   : > { %4370 = vrot.lane.b32.xlu0 %v4893_v49, %s5697_s22  ;;  %v4117_v1 = vpack.c.bf16 %v1650_v0, %v1649_v63  ;;  %v1934_v63 = vld [vmem:[%s5684_s13 + $0x80] sm:$0xff]  ;;  %v1935_v0 = vld [vmem:[%s5684_s13 + $0x88] sm:$0xff]  ;;  %s5727_s22 = smov 16  }
 0x98c   : > { %4118 = vmatprep.subr.bf16.mxu0 %v4117_v1 }
 0x98d   : > { %4120 = vmatpush3.bf16.msra.mxu0 %v4117_v1  ;;  %v1918_v1 = vld [vmem:[%s5684_s13] sm:$0xff] }
 0x9f9   : > { %v1516_v31 = vpop.xlane.xlu1 %1515 }
 0x9fd   : > { %v1519_v32 = vpop.xlane.xlu0 %1518  ;;  %v1316_v33 = vpop.xlane.xlu1 %1315 }
 0x9fe   : > { %4437 = vrcp.f32 %v1316_v33 }
 0x9ff   : > { %4439 = vrcp.f32 %v1516_v31 }
 0xa01   : > { %v1319_v34 = vpop.xlane.xlu0 %1318  ;;  %v4366_v35 = vpop.permute.xlu1 %4365 }
 0xa02   : > { %4441 = vrcp.f32 %v1319_v34  ;;  %v4368_v36 = vunpack.i.h.bf16 %v4366_v35  ;;  %v4367_v37 = vunpack.i.l.bf16 %v4366_v35 }
 0xa03   : > { %4443 = vrcp.f32 %v1519_v32 }
 0xa04   : > { %v4091_v38 = vpack.c.bf16 %v4368_v36, %v4367_v37  ;;  %v1788_v36 = vld [vmem:[%s5682_s11 + $0x8] sm:$0xff]  ;;  %v1790_v37 = vld [vmem:[%s5682_s11 + $0x18] sm:$0xff] }
 0xa05   : > { %v4371_v39 = vpop.permute.xlu0 %4370  ;;  %v1614_v6 = vpop.permute.xlu1 %1613 }
 0xa06   : > { %v4373_v40 = vunpack.i.h.bf16 %v4371_v39  ;;  %v4372_v41 = vunpack.i.l.bf16 %v4371_v39  ;;  %4092 = vmatprep.subr.bf16.mxu1 %v4091_v38  ;;  %v1635_v10 = vsel %vm820_vm1, %v4931_v20, %v1614_v6  ;;  %v3573_v20 = vld [vmem:[%s5679_s8] ss:$0 sm:$0xff] }
 0xa07   : > { %4094 = vmatpush3.bf16.msra.mxu1 %v4091_v38  ;;  %v4121_v38 = vpack.c.bf16 %v1790_v37, %v1788_v36  ;;  %v1787_v39 = vld [vmem:[%s5682_s11] sm:$0xff]  ;;  %v1941_v36 = vld [vmem:[%s5684_s13 + $0xb8] sm:$0xff] }
 0xa08   : > { %v4101_v42 = vpack.c.bf16 %v4373_v40, %v4372_v41  ;;  %v4438_v43 = vpop.eup %4437  ;;  %v1789_v40 = vld [vmem:[%s5682_s11 + $0x10] sm:$0xff] }
 0xa09   : > { %v1322_v49 = vmul.f32 %v4438_v43, %v4432_v25  ;;  %v4440_v44 = vpop.eup %4439  ;;  %v1616_v7 = vpop.permute.xlu1 %1615  ;;  %v4123_v41 = vpack.c.bf16 %v1789_v40, %v1787_v39  ;;  %v1794_v43 = vld [vmem:[%s5682_s11 + $0x38] sm:$0xff]  ;;  %v1942_v40 = vld [vmem:[%s5684_s13 + $0xc0] sm:$0xff] }
 0xa0a   : > { %4102 = vmatprep.subr.bf16.mxu1 %v4101_v42  ;;  %v1522_v51 = vmul.f32 %v4440_v44, %v4430_v22  ;;  %v1636_v12 = vsel %vm820_vm1, %v4929_v19, %v1616_v7  ;;  %v1791_v44 = vld [vmem:[%s5682_s11 + $0x20] sm:$0xff] }
 0xa0b   : > { %3902 = vmatprep.mubr.msk.f32.mxu1 %vm820_vm1, %v1322_v49 }
 0xa0c   : > { %v4442_v45 = vpop.eup %4441 }
 0xa0d   : > { %v1323_v47 = vmul.f32 %v4442_v45, %v4436_v29  ;;  %v4444_v48 = vpop.eup %4443  ;;  %v1793_v45 = vld [vmem:[%s5682_s11 + $0x30] sm:$0xff] }
 0xa0e   : > { %v1523_v53 = vmul.f32 %v4444_v48, %v4434_v26  ;;  %v1796_v48 = vld [vmem:[%s5682_s11 + $0x48] sm:$0xff] }
 0xa0f   : > { %3903 = vmatmul.mubr.msk.f32.vlgmr.msra.gmra.mrb[10].mxu1 %vm820_vm1, %v1323_v47  ;;  %v4127_v47 = vpack.c.bf16 %v1793_v45, %v1791_v44  ;;  %v1944_v45 = vld [vmem:[%s5684_s13 + $0xd0] sm:$0xff] }
 0xa10   : > { %4104 = vmatpush3.bf16.msra.mxu1 %v4101_v42  ;;  %3916 = vmatprep.mubr.msk.f32.mxu1 %vm820_vm1, %v1522_v51  ;;  %v1792_v42 = vld [vmem:[%s5682_s11 + $0x28] sm:$0xff]  ;;  %v1798_v51 = vld [vmem:[%s5682_s11 + $0x58] sm:$0xff] }
 0xa11   : > { %4122 = vmatprep.subr.bf16.mxu1 %v4121_v38  ;;  %v4125_v49 = vpack.c.bf16 %v1794_v43, %v1792_v42  ;;  %v1925_v38 = vld [vmem:[%s5684_s13 + $0x38] sm:$0xff]  ;;  %v1926_v43 = vld [vmem:[%s5684_s13 + $0x40] sm:$0xff] }
 0xa13   : > { %3917 = vmatmul.mubr.msk.f32.vlgmr.msra.gmra.mrb[12].mxu1 %vm820_vm1, %v1523_v53  ;;  %v4129_v53 = vpack.c.bf16 %v1798_v51, %v1796_v48  ;;  %v1928_v51 = vld [vmem:[%s5684_s13 + $0x50] sm:$0xff] }
 0xa14   : > { %1885 = vmatprep.mubr.f32.mxu1 %v4574_v24  ;;  %4124 = vmatpush1.bf16.msra.mxu1 %v4123_v41  ;;  %v1943_v41 = vld [vmem:[%s5684_s13 + $0xc8] sm:$0xff] }
 0xa15   : > { %4126 = vmatprep.subr.bf16.mxu1 %v4125_v49  ;;  %v4153_v42 = vpack.c.bf16 %v1943_v41, %v1942_v40  ;;  %v1927_v49 = vld [vmem:[%s5684_s13 + $0x48] sm:$0xff] }
 0xa16   : > { %v4155_v44 = vpack.c.bf16 %v1927_v49, %v1926_v43 }
 0xa18   : > { %4128 = vmatpush1.bf16.msra.mxu1 %v4127_v47  ;;  %v1945_v47 = vld [vmem:[%s5684_s13 + $0xd8] sm:$0xff] }
 0xa19   : > { %4130 = vmatprep.subr.bf16.mxu1 %v4129_v53  ;;  %v4157_v48 = vpack.c.bf16 %v1945_v47, %v1944_v45  ;;  %v1929_v53 = vld [vmem:[%s5684_s13 + $0x58] sm:$0xff] }
 0xa1a   : > { %v4159_v54 = vpack.c.bf16 %v1929_v53, %v1928_v51 }
 0xa1c   : > { %4132 = vmatpush1.bf16.msra.mxu1 %v4131_v57  ;;  %v1947_v57 = vld [vmem:[%s5684_s13 + $0xe8] sm:$0xff] }
 0xa1d   : > { %4134 = vmatprep.subr.bf16.mxu1 %v4133_v60  ;;  %v4161_v58 = vpack.c.bf16 %v1947_v57, %v1946_v56  ;;  %v4163_v60 = vpack.c.bf16 %v1931_v50, %v1930_v59 }
 0xa20   : > { %4136 = vmatpush1.bf16.msra.mxu1 %v4135_v62  ;;  %v1949_v62 = vld [vmem:[%s5684_s13 + $0xf8] sm:$0xff] }
 0xae2   : > { %v3904_v2 = vpop.f32.mrb[10].mxu1 }
 0xae3   : > { %1623 = vrot.lane.b32.xlu0 %v3904_v2, %s5706_s26  ;;  %v1402_v3 = vpop.f32.mrb[11].mxu1  ;;  %v4137_v2 = vpack.c.bf16 %v1935_v0, %v1934_v63  ;;  %v4165_v63 = vpack.c.bf16 %v1949_v62, %v1948_v61  ;;  %v1932_v0 = vld [vmem:[%s5684_s13 + $0x70] sm:$0xff] }
 0xae4   : > { %1621 = vrot.lane.b32.xlu1 %v1402_v3, %s5706_s26  ;;  %v1919_v3 = vld [vmem:[%s5684_s13 + $0x8] sm:$0xff]  ;;  %s5723_s26 = smov 64  }
 0xae5   : > { %v4139_v6 = vpack.c.bf16 %v1919_v3, %v1918_v1  ;;  %4138 = vmatprep.subr.bf16.mxu0 %v4137_v2  ;;  %v1933_v1 = vld [vmem:[%s5684_s13 + $0x78] sm:$0xff]  ;;  %v1805_v3 = vlaneseq }
 0xae6   : > { %v3918_v4 = vpop.f32.mrb[12].mxu1  ;;  %v4167_v2 = vpack.c.bf16 %v1933_v1, %v1932_v0  ;;  %v3586_v0 = vld [vmem:[%s5677_s6 + $0x98] sm:$0xff] }
 0xae7   : > { %1631 = vrot.lane.b32.xlu0 %v3918_v4, %s4577_s18  ;;  %v1602_v5 = vpop.f32.mrb[13].mxu1  ;;  %v1936_v4 = vld [vmem:[%s5684_s13 + $0x90] sm:$0xff] }
 0xae8   : > { %1629 = vrot.lane.b32.xlu1 %v1602_v5, %s4577_s18  ;;  %v1937_v5 = vld [vmem:[%s5684_s13 + $0x98] sm:$0xff] }
 0xae9   : > { %v4141_v7 = vpack.c.bf16 %v1937_v5, %v1936_v4  ;;  %v5203_v4 = vshrl.u32 %v1805_v3, 7  ;;  %v3585_v3 = vld [vmem:[%s5677_s6 + $0x90] sm:$0xff] }
 0xaeb   : > { %v1807_v5 = vsub.s32 0, %v5203_v4 }
 0xb55   : > { %v1624_v8 = vpop.permute.xlu0 %1623 }
 0xb56   : > { %v1622_v9 = vpop.permute.xlu1 %1621  ;;  %v1639_v15 = vsel %vm1637_vm3, %v1636_v12, %v1624_v8  ;;  %v1920_v8 = vld [vmem:[%s5684_s13 + $0x10] sm:$0xff] }
 0xb57   : > { %v1638_v13 = vsel %vm1637_vm3, %v1635_v10, %v1622_v9  ;;  %v1921_v9 = vld [vmem:[%s5684_s13 + $0x18] sm:$0xff]  ;;  %v1938_v10 = vld [vmem:[%s5684_s13 + $0xa0] sm:$0xff] }
 0xb58   : > { %v4143_v12 = vpack.c.bf16 %v1921_v9, %v1920_v8 }
 0xb59   : > { %v1632_v11 = vpop.permute.xlu0 %1631 }
 0xb5a   : > { %v1630_v14 = vpop.permute.xlu1 %1629  ;;  %v1642_v17 = vsel %vm1640_vm4, %v1639_v15, %v1632_v11  ;;  %v1939_v11 = vld [vmem:[%s5684_s13 + $0xa8] sm:$0xff] }
 0xb5b   : > { %v1641_v16 = vsel %vm1640_vm4, %v1638_v13, %v1630_v14  ;;  %v4145_v13 = vpack.c.bf16 %v1939_v11, %v1938_v10  ;;  %v1922_v14 = vld [vmem:[%s5684_s13 + $0x20] sm:$0xff]  ;;  %v1923_v15 = vld [vmem:[%s5684_s13 + $0x28] sm:$0xff] }
 0xb5c   : > { %3935 = vmatprep.mubr.msk.f32.mxu0 %vm582_vm0, %v1641_v16  ;;  %v4147_v16 = vpack.c.bf16 %v1923_v15, %v1922_v14 }
 0xb5d   : > { %3936 = vmatmul.mubr.msk.f32.vlgmr.msra.gmra.mrb[10].mxu0 %vm582_vm0, %v1642_v17 }
 0xb5e   : > { %4140 = vmatpush3.bf16.msra.mxu0 %v4139_v6  ;;  %v1803_v6 = vld [vmem:[%s5683_s12] sm:$0x3] }
 0xb5f   : > { %4142 = vmatprep.subr.bf16.mxu0 %v4141_v7  ;;  %v1811_v7 = vsub.s32 1, %v5203_v4  ;;  %v1808_v8 = vrot.slane %v1803_v6, %v1807_v5 }
 0xb61   : > { %v1812_v9 = vrot.slane %v1803_v6, %v1811_v7 }
 0xb62   : > { %4144 = vmatpush3.bf16.msra.mxu0 %v4143_v12 }
 0xb63   : > { %4146 = vmatprep.subr.bf16.mxu0 %v4145_v13 }
 0xb66   : > { %4148 = vmatpush3.bf16.msra.mxu0 %v4147_v16 }
 0xc30   : > { %v3937_v18 = vpop.f32.mrb[10].mxu0 }
 0xc31   : > { %v1733_v19 = vadd.f32 %v3937_v18, %v4821_v52  ;;  %v1723_v21 = vpop.f32.mrb[11].mxu0 }
 0xc32   : > { %v1732_v22 = vadd.f32 %v1723_v21, %v4814_v46 }
 0xc33   : > { %v5027_v23 = vadd.f32 %v3573_v20, %v1733_v19 }
 0xc34   : > { %v5029_v25 = vadd.f32 %v3573_v20, %v1732_v22 }
 0xc35   : > { %v1748_v26 = vsel %vm582_vm0, %v5027_v23, 0.0 }
 0xc36   : > { %1749 = vadd.xlane.f32.xlu0 %v1748_v26  ;;  %v1745_v27 = vsel %vm582_vm0, %v5029_v25, 0.0 }
 0xc37   : > { %1746 = vadd.xlane.f32.xlu1 %v1745_v27  ;;  %v3574_v27 = vld [vmem:[%s5680_s9] ss:$0 sm:$0xff] }
 0xcc3   : > { %v1750_v28 = vpop.xlane.xlu0 %1749 }
 0xcc4   : > { %v1752_v29 = vmul.f32 0.015625, %v1750_v28  ;;  %v1747_v30 = vpop.xlane.xlu1 %1746 }
 0xcc5   : > { %v1751_v31 = vmul.f32 0.015625, %v1747_v30 }
 0xcc6   : > { %v5036_v52 = vsub.f32 %v5027_v23, %v1752_v29  ;;  %v3575_v29 = vld [vmem:[%s5681_s10] ss:$0 sm:$0xff] }
 0xcc7   : > { %v5039_v46 = vsub.f32 %v5029_v25, %v1751_v31 }
 0xcc8   : > { %v1756_v34 = vmul.f32 %v5036_v52, %v5036_v52 }
 0xcc9   : > { %v1755_v32 = vmul.f32 %v5039_v46, %v5039_v46 }
 0xcca   : > { %v1760_v35 = vsel %vm582_vm0, %v1756_v34, 0.0 }
 0xccb   : > { %v1757_v33 = vsel %vm582_vm0, %v1755_v32, 0.0 }
 0xccc   : > { %1758 = vadd.xlane.f32.xlu0 %v1757_v33 }
 0xcd0   : > { %1761 = vadd.xlane.f32.xlu0 %v1760_v35 }
 0xd59   : > { %v1759_v17 = vpop.xlane.xlu0 %1758 }
 0xd5a   : > { %v1763_v18 = vmul.f32 0.015625, %v1759_v17 }
 0xd5c   : > { %v1765_v20 = vadd.f32 1e-05, %v1763_v18 }
 0xd5d   : > { %v1762_v19 = vpop.xlane.xlu0 %1761 }
 0xd5e   : > { %4445 = vrsqrt.f32 %v1765_v20  ;;  %v1764_v21 = vmul.f32 0.015625, %v1762_v19 }
 0xd60   : > { %v1766_v22 = vadd.f32 1e-05, %v1764_v21 }
 0xd62   : > { %4447 = vrsqrt.f32 %v1766_v22 }
 0xd68   : > { %v4446_v26 = vpop.eup %4445 }
 0xd69   : > { %v1769_v28 = vmul.f32 %v4446_v26, %v5039_v46  ;;  %v1940_v46 = vld [vmem:[%s5684_s13 + $0xb0] sm:$0xff] }
 0xd6a   : > { %v4149_v37 = vpack.c.bf16 %v1941_v36, %v1940_v46 }
 0xd6b   : > { %v1777_v30 = vmul.f32 %v3574_v27, %v1769_v28 }
 0xd6c   : > { %v4448_v31 = vpop.eup %4447  ;;  %4150 = vmatprep.subr.bf16.mxu0 %v4149_v37 }
 0xd6d   : > { %v1785_v32 = vadd.f32 %v3575_v29, %v1777_v30  ;;  %v1770_v33 = vmul.f32 %v4448_v31, %v5036_v52  ;;  %v1924_v52 = vld [vmem:[%s5684_s13 + $0x30] sm:$0xff] }
 0xd6e   : > { %v4151_v39 = vpack.c.bf16 %v1925_v38, %v1924_v52 }
 0xd6f   : > { %3576 = vmatmul.mubr.msk.f32.vlgmr.msra.gmra.mrb[14].mxu1 %vm582_vm0, %v1785_v32  ;;  %v1778_v34 = vmul.f32 %v3574_v27, %v1770_v33 }
 0xd70   : > { %1891 = vmatprep.mubr.f32.mxu1 %v4574_v24  ;;  %4152 = vmatpush3.bf16.msra.mxu0 %v4151_v39 }
 0xd71   : > { %v1786_v35 = vadd.f32 %v3575_v29, %v1778_v34  ;;  %4154 = vmatprep.subr.bf16.mxu0 %v4153_v42  ;;  %v3578_v42 = vld [vmem:[%s5685_s14] ss:$0 sm:$0xff] }
 0xd73   : > { %3577 = vmatmul.mubr.msk.f32.gmra.mrb[16].mxu1 %vm582_vm0, %v1786_v35 }
 0xd74   : > { %2169 = vmatprep.mubr.f32.mxu1 %v4574_v24  ;;  %4156 = vmatpush3.bf16.msra.mxu0 %v4155_v44 }
 0xd75   : > { %4158 = vmatprep.subr.bf16.mxu0 %v4157_v48 }
 0xd78   : > { %4160 = vmatpush3.bf16.msra.mxu0 %v4159_v54 }
 0xd79   : > { %4162 = vmatprep.subr.bf16.mxu0 %v4161_v58 }
 0xd7c   : > { %4164 = vmatpush3.bf16.msra.mxu0 %v4163_v60 }
 0xd7d   : > { %4166 = vmatprep.subr.bf16.mxu0 %v4165_v63  ;;  %v3584_v63 = vld [vmem:[%s5677_s6 + $0x88] sm:$0xff] }
 0xd7e   : > { %v4169_v1 = vpack.c.bf16 %v3586_v0, %v3584_v63 }
 0xd80   : > { %4168 = vmatpush3.bf16.msra.mxu0 %v4167_v2  ;;  %v3583_v2 = vld [vmem:[%s5677_s6 + $0x80] sm:$0xff]  ;;  %4170 = vmatprep.subr.bf16.mxu1 %v4169_v1 }
 0xd81   : > { %v4171_v6 = vpack.c.bf16 %v3585_v3, %v3583_v2 }
 0xd83   : > { %4172 = vmatpush1.bf16.msra.mxu1 %v4171_v6 }
 0xe42   : > { %v1887_v10 = vpop.f32.mrb[14].mxu1 }
 0xe43   : > { %v1888_v11 = vadd.f32 %v1887_v10, %v1808_v8  ;;  %v1889_v12 = vpop.f32.mrb[15].mxu1 }
 0xe44   : > { %v1890_v13 = vadd.f32 %v1889_v12, %v1812_v9  ;;  %v3589_v12 = vld [vmem:[%s5677_s6 + $0xb0] sm:$0xff] }
 0xe45   : > { %v1902_v14 = vmul.f32 0.70710677, %v1888_v11  ;;  %v1898_v30 = vmul.f32 0.5, %v1888_v11  ;;  %v3587_v11 = vld [vmem:[%s5677_s6 + $0xa0] sm:$0xff] }
 0xe46   : > { %v1903_v15 = vmul.f32 0.70710677, %v1890_v13  ;;  %v1893_v16 = vpop.f32.mrb[16].mxu1  ;;  %v1899_v28 = vmul.f32 0.5, %v1890_v13  ;;  %v4175_v13 = vpack.c.bf16 %v3589_v12, %v3587_v11 }
 0xe47   : > { %4449 = verf.f32 %v1902_v14  ;;  %v1894_v17 = vadd.f32 %v1893_v16, %v1808_v8  ;;  %v1895_v18 = vpop.f32.mrb[17].mxu1  ;;  %v3588_v8 = vld [vmem:[%s5677_s6 + $0xa8] sm:$0xff] }
 0xe48   : > { %4451 = verf.f32 %v1903_v15  ;;  %v1896_v20 = vadd.f32 %v1895_v18, %v1812_v9  ;;  %v3590_v9 = vld [vmem:[%s5677_s6 + $0xb8] sm:$0xff]  ;;  %v3592_v14 = vld [vmem:[%s5677_s6 + $0xc8] sm:$0xff]  ;;  %v3593_v18 = vld [vmem:[%s5677_s6 + $0xd0] sm:$0xff] }
 0xe49   : > { %v1904_v19 = vmul.f32 0.70710677, %v1894_v17  ;;  %v1900_v37 = vmul.f32 0.5, %v1894_v17  ;;  %v4173_v10 = vpack.c.bf16 %v3590_v9, %v3588_v8  ;;  %v3594_v15 = vld [vmem:[%s5677_s6 + $0xd8] sm:$0xff]  ;;  %v3591_v17 = vld [vmem:[%s5677_s6 + $0xc0] sm:$0xff] }
 0xe4a   : > { %v1905_v21 = vmul.f32 0.70710677, %v1896_v20  ;;  %v1901_v46 = vmul.f32 0.5, %v1896_v20  ;;  %v4177_v16 = vpack.c.bf16 %v3594_v15, %v3592_v14  ;;  %v4179_v20 = vpack.c.bf16 %v3593_v18, %v3591_v17 }
 0xe4b   : > { %4453 = verf.f32 %v1904_v19  ;;  %4174 = vmatprep.subr.bf16.mxu1 %v4173_v10  ;;  %v3596_v19 = vld [vmem:[%s5677_s6 + $0xe8] sm:$0xff] }
 0xe4c   : > { %4455 = verf.f32 %v1905_v21  ;;  %4176 = vmatpush1.bf16.msra.mxu1 %v4175_v13  ;;  %v3598_v21 = vld [vmem:[%s5677_s6 + $0xf8] sm:$0xff] }
 0xe4d   : > { %4178 = vmatprep.subr.bf16.mxu1 %v4177_v16 }
 0xe50   : > { %4180 = vmatpush1.bf16.msra.mxu1 %v4179_v20 }
 0xe51   : > { %v4450_v22 = vpop.eup %4449 }
 0xe52   : > { %v4452_v26 = vpop.eup %4451  ;;  %v1910_v27 = vadd.f32 1.0, %v4450_v22  ;;  %v4181_v22 = vpack.c.bf16 %v3598_v21, %v3596_v19 }
 0xe53   : > { %v1911_v29 = vadd.f32 1.0, %v4452_v26  ;;  %v3595_v26 = vld [vmem:[%s5677_s6 + $0xe0] sm:$0xff] }
 0xe54   : > { %v1914_v34 = vmul.f32 %v1910_v27, %v1898_v30  ;;  %v3597_v27 = vld [vmem:[%s5677_s6 + $0xf0] sm:$0xff]  ;;  %4182 = vmatprep.subr.bf16.mxu1 %v4181_v22 }
 0xe55   : > { %v4454_v31 = vpop.eup %4453  ;;  %v1915_v32 = vmul.f32 %v1911_v29, %v1899_v28  ;;  %v4183_v28 = vpack.c.bf16 %v3597_v27, %v3595_v26 }
 0xe56   : > { %v4456_v33 = vpop.eup %4455  ;;  %v1912_v35 = vadd.f32 1.0, %v4454_v31 }
 0xe57   : > { %v1913_v36 = vadd.f32 1.0, %v4456_v33  ;;  %2014 = vmatprep.mubr.f32.mxu0 %v1915_v32  ;;  %4184 = vmatpush1.bf16.msra.mxu1 %v4183_v28 }
 0xe58   : > { %2015 = vmatmul.mubr.f32.vlgmr.msra.gmra.mrb[12].mxu0 %v1914_v34  ;;  %v1916_v38 = vmul.f32 %v1912_v35, %v1900_v37  ;;  %v3582_v37 = vld [vmem:[%s5676_s5 + $0x1] ss:$0 sm:$0xff] }
 0xe59   : > { %v1917_v52 = vmul.f32 %v1913_v36, %v1901_v46  ;;  %v3581_v46 = vld [vmem:[%s5675_s4 + $0x1] ss:$0 sm:$0xff] }
 0xe5b   : > { %2019 = vmatprep.mubr.f32.mxu0 %v1917_v52 }
 0xe5c   : > { %2020 = vmatmul.mubr.f32.gmra.mrb[14].mxu0 %v1916_v38 }
 0xf2b   : > { %v3777_v39 = vpop.f32.mrb[12].mxu0 }
 0xf2c   : > { %v3778_v40 = vpop.f32.mrb[13].mxu0 }
 0xf2d   : > { %v3779_v41 = vadd.f32 %v3778_v40, %v3777_v39 }
 0xf2f   : > { %v2025_v43 = vadd.f32 %v3779_v41, %v5029_v25  ;;  %v3780_v49 = vpop.f32.mrb[14].mxu0 }
 0xf30   : > { %v3781_v44 = vpop.f32.mrb[15].mxu0 }
 0xf31   : > { %v5218_v45 = vadd.f32 %v3578_v42, %v2025_v43  ;;  %v3782_v47 = vadd.f32 %v3781_v44, %v3780_v49 }
 0xf33   : > { %v2026_v48 = vadd.f32 %v3782_v47, %v5027_v23  ;;  %v2040_v51 = vsel %vm582_vm0, %v5218_v45, 0.0 }
 0xf34   : > { %2041 = vadd.xlane.f32.xlu1 %v2040_v51 }
 0xf35   : > { %v5223_v53 = vadd.f32 %v3578_v42, %v2026_v48 }
 0xf37   : > { %v2043_v54 = vsel %vm582_vm0, %v5223_v53, 0.0 }
 0xf38   : > { %2044 = vadd.xlane.f32.xlu0 %v2043_v54 }
 0xfc1   : > { %v2042_v56 = vpop.xlane.xlu1 %2041 }
 0xfc2   : > { %v2046_v57 = vmul.f32 0.015625, %v2042_v56 }
 0xfc4   : > { %v2048_v25 = vsub.f32 %v5218_v45, %v2046_v57 }
 0xfc5   : > { %v2045_v58 = vpop.xlane.xlu0 %2044 }
 0xfc6   : > { %v2047_v59 = vmul.f32 0.015625, %v2045_v58  ;;  %v2050_v50 = vmul.f32 %v2048_v25, %v2048_v25 }
 0xfc8   : > { %v2049_v60 = vsub.f32 %v5223_v53, %v2047_v59  ;;  %v2052_v23 = vsel %vm582_vm0, %v2050_v50, 0.0 }
 0xfc9   : > { %2053 = vadd.xlane.f32.xlu1 %v2052_v23 }
 0xfca   : > { %v2051_v61 = vmul.f32 %v2049_v60, %v2049_v60 }
 0xfcc   : > { %v2055_v62 = vsel %vm582_vm0, %v2051_v61, 0.0 }
 0xfcd   : > { %2056 = vadd.xlane.f32.xlu0 %v2055_v62 }
0x1056   : > { %v2054_v29 = vpop.xlane.xlu1 %2053 }
0x1057   : > { %v2058_v30 = vmul.f32 0.015625, %v2054_v29 }
0x1059   : > { %v2060_v31 = vadd.f32 1e-05, %v2058_v30 }
0x105a   : > { %v2057_v32 = vpop.xlane.xlu0 %2056 }
0x105b   : > { %4457 = vrsqrt.f32 %v2060_v31  ;;  %v2059_v33 = vmul.f32 0.015625, %v2057_v32 }
0x105d   : > { %v2061_v34 = vadd.f32 1e-05, %v2059_v33 }
0x105f   : > { %4459 = vrsqrt.f32 %v2061_v34 }
0x1065   : > { %v4458_v35 = vpop.eup %4457 }
0x1066   : > { %v2064_v36 = vmul.f32 %v4458_v35, %v2048_v25 }
0x1068   : > { %v2072_v52 = vmul.f32 %v3581_v46, %v2064_v36 }
0x1069   : > { %v4460_v38 = vpop.eup %4459 }
0x106a   : > { %v2080_v39 = vadd.f32 %v3582_v37, %v2072_v52  ;;  %v2065_v40 = vmul.f32 %v4460_v38, %v2049_v60 }
0x106c   : > { %3599 = vmatmul.mubr.msk.f32.vlgmr.msra.gmra.mrb[18].mxu1 %vm582_vm0, %v2080_v39  ;;  %v2073_v41 = vmul.f32 %v3581_v46, %v2065_v40 }
0x106d   : > { %2175 = vmatprep.mubr.f32.mxu1 %v4574_v24 }
0x106e   : > { %v2081_v42 = vadd.f32 %v3582_v37, %v2073_v41 }
0x1070   : > { %3600 = vmatmul.mubr.msk.f32.gmra.mrb[20].mxu1 %vm582_vm0, %v2081_v42 }
0x113f   : > { %v2171_v43 = vpop.f32.mrb[18].mxu1 }
0x1140   : > { %v2173_v49 = vpop.f32.mrb[19].mxu1  ;;  %v5288_v44 = vmul.f32 0.25, %v2171_v43 }
0x1142   : > { %3942 = vmatprep.mubr.msk.f32.mxu1 %vm820_vm1, %v5288_v44 }
0x1143   : > { %v2177_v47 = vpop.f32.mrb[20].mxu1 }
0x1144   : > { %v2179_v48 = vpop.f32.mrb[21].mxu1  ;;  %v5292_v51 = vpack.i.bf16 %v2177_v47, %v2171_v43  ;;  %v5302_v57 = vmul.f32 0.25, %v2177_v47 }
0x1145   : > { %v4191_v54 = vpack.c.bf16 %v2179_v48, %v2173_v49  ;;  %v5294_v56 = vpack.i.bf16 %v2179_v48, %v2173_v49 }
0x1146   : > { %4375 = vrot.lane.b32.xlu1 %v5292_v51, %s5723_s26  ;;  %s3537_s26 = sshll.u32 %s539_s19, 4 }
0x114a   : > { %4380 = vrot.lane.b32.xlu1 %v5292_v51, %s4577_s18 }
0x114e   : > { %4385 = vrot.lane.b32.xlu1 %v5292_v51, %s5724_s30 }
0x1152   : > { %2380 = vrot.lane.b32.xlu1 %v5302_v57, %s5725_s24 }
0x1156   : > { %2580 = vrot.lane.b32.xlu1 %v5288_v44, %s5726_s27 }
0x115a   : > { %2582 = vrot.lane.b32.xlu1 %v5302_v57, %s5726_s27 }
0x11b8   : > { %v4376_v25 = vpop.permute.xlu1 %4375 }
0x11b9   : > { %v4378_v58 = vunpack.i.h.bf16 %v4376_v25  ;;  %v4377_v59 = vunpack.i.l.bf16 %v4376_v25 }
0x11bb   : > { %v4185_v50 = vpack.c.bf16 %v4378_v58, %v4377_v59 }
0x11bc   : > { %v4381_v60 = vpop.permute.xlu1 %4380 }
0x11bd   : > { %4187 = vmatprep.subr.msk.bf16.mxu1 %vm4905_vm2, %v4185_v50  ;;  %v4383_v23 = vunpack.i.h.bf16 %v4381_v60  ;;  %v4382_v61 = vunpack.i.l.bf16 %v4381_v60 }
0x11be   : > { %4190 = vmatpush3.bf16.xpose.msk.msra.mxu1 %vm4905_vm2, %v4185_v50 }
0x11bf   : > { %4192 = vmatprep.subr.bf16.mxu1 %v4191_v54  ;;  %v4195_v62 = vpack.c.bf16 %v4383_v23, %v4382_v61 }
0x11c0   : > { %v4386_v20 = vpop.permute.xlu1 %4385 }
0x11c1   : > { %v4388_v21 = vunpack.i.h.bf16 %v4386_v20  ;;  %v4387_v22 = vunpack.i.l.bf16 %v4386_v20 }
0x11c3   : > { %v4205_v28 = vpack.c.bf16 %v4388_v21, %v4387_v22 }
0x11c4   : > { %v2381_v30 = vpop.permute.xlu1 %2380 }
0x11c5   : > { %3943 = vmatmul.mubr.msk.f32.vlgmr.msra.gmra.mrb[22].mxu1 %vm820_vm1, %v5302_v57 }
0x11c6   : > { %4194 = vmatpush3.bf16.msra.mxu1 %v4191_v54 }
0x11c7   : > { %4197 = vmatprep.subr.msk.bf16.mxu1 %vm4905_vm2, %v4195_v62 }
0x11c8   : > { %v2581_v31 = vpop.permute.xlu1 %2580 }
0x11cc   : > { %v2583_v32 = vpop.permute.xlu1 %2582 }
0x1298   : > { %v3944_v63 = vpop.f32.mrb[22].mxu1 }
0x1299   : > { %v2266_v0 = vpop.f32.mrb[23].mxu1  ;;  %v2278_v2 = vsel %vm820_vm1, %v3944_v63, -inf }
0x129a   : > { %v2275_v1 = vsel %vm820_vm1, %v2266_v0, -inf }
0x129b   : > { %2276 = vmax.xlane.f32.xlu0 %v2275_v1 }
0x129f   : > { %2279 = vmax.xlane.f32.xlu0 %v2278_v2 }
0x1328   : > { %v2277_v3 = vpop.xlane.xlu0 %2276 }
0x1329   : > { %v2281_v6 = vsub.f32 %v2266_v0, %v2277_v3 }
0x132b   : > { %v2283_v8 = vmul.f32 1.442695, %v2281_v6 }
0x132c   : > { %v2280_v9 = vpop.xlane.xlu0 %2279 }
0x132d   : > { %4461 = vpow2.f32 %v2283_v8  ;;  %v2282_v10 = vsub.f32 %v3944_v63, %v2280_v9 }
0x132f   : > { %v2285_v11 = vmul.f32 1.442695, %v2282_v10 }
0x1331   : > { %4463 = vpow2.f32 %v2285_v11 }
0x1337   : > { %v4462_v12 = vpop.eup %4461 }
0x1338   : > { %v2287_v13 = vsel %vm820_vm1, %v4462_v12, 0.0 }
0x1339   : > { %2288 = vadd.xlane.f32.xlu0 %v2287_v13 }
0x133b   : > { %v4464_v14 = vpop.eup %4463 }
0x133c   : > { %v2290_v15 = vsel %vm820_vm1, %v4464_v14, 0.0 }
0x133d   : > { %2291 = vadd.xlane.f32.xlu0 %v2290_v15 }
0x1353   : > { %2378 = vrot.lane.b32.xlu0 %v5288_v44, %s5725_s24 }
0x13c6   : > { %v2289_v16 = vpop.xlane.xlu0 %2288 }
0x13c7   : > { %4465 = vrcp.f32 %v2289_v16 }
0x13ca   : > { %v2292_v17 = vpop.xlane.xlu0 %2291 }
0x13cb   : > { %4467 = vrcp.f32 %v2292_v17 }
0x13ce   : > { %v2379_v29 = vpop.permute.xlu0 %2378 }
0x13d1   : > { %v4466_v18 = vpop.eup %4465 }
0x13d2   : > { %v2295_v19 = vmul.f32 %v4466_v18, %v4462_v12 }
0x13d4   : > { %3949 = vmatprep.mubr.msk.f32.mxu1 %vm820_vm1, %v2295_v19 }
0x13d5   : > { %v4468_v26 = vpop.eup %4467 }
0x13d6   : > { %v2296_v27 = vmul.f32 %v4468_v26, %v4464_v14 }
0x13d8   : > { %3950 = vmatmul.mubr.msk.f32.vlgmr.msra.gmra.mrb[24].mxu1 %vm820_vm1, %v2296_v27 }
0x13d9   : > { %4200 = vmatpush3.bf16.xpose.msk.msra.mxu1 %vm4905_vm2, %v4195_v62  ;;  %3956 = vmatprep.mubr.msk.f32.mxu1 %vm820_vm1, %v2379_v29 }
0x13da   : > { %4207 = vmatprep.subr.msk.bf16.mxu1 %vm4905_vm2, %v4205_v28 }
0x13e0   : > { %3957 = vmatmul.mubr.msk.f32.vlgmr.msra.gmra.mrb[26].mxu1 %vm820_vm1, %v2381_v30 }
0x13e1   : > { %4210 = vmatpush3.bf16.xpose.msk.msra.mxu1 %vm4905_vm2, %v4205_v28  ;;  %3970 = vmatprep.mubr.msk.f32.mxu1 %vm820_vm1, %v2581_v31 }
0x13e8   : > { %3971 = vmatmul.mubr.msk.f32.vlgmr.msra.gmra.mrb[28].mxu1 %vm820_vm1, %v2583_v32 }
0x14ab   : > { %v5336_v33 = vpop.f32.mrb[24].mxu1 }
0x14ac   : > { %v5338_v34 = vpop.f32.mrb[25].mxu1 }
0x14b3   : > { %v3958_v35 = vpop.f32.mrb[26].mxu1 }
0x14b4   : > { %v2460_v46 = vpop.f32.mrb[27].mxu1  ;;  %v2472_v36 = vsel %vm820_vm1, %v3958_v35, -inf }
0x14b5   : > { %2473 = vmax.xlane.f32.xlu0 %v2472_v36  ;;  %v2469_v37 = vsel %vm820_vm1, %v2460_v46, -inf }
0x14b6   : > { %2470 = vmax.xlane.f32.xlu1 %v2469_v37 }
0x14bb   : > { %v3972_v52 = vpop.f32.mrb[28].mxu1 }
0x14bc   : > { %v2662_v38 = vpop.f32.mrb[29].mxu1  ;;  %v2674_v39 = vsel %vm820_vm1, %v3972_v52, -inf }
0x14bd   : > { %2675 = vmax.xlane.f32.xlu1 %v2674_v39  ;;  %v2671_v40 = vsel %vm820_vm1, %v2662_v38, -inf }
0x14be   : > { %2672 = vmax.xlane.f32.xlu0 %v2671_v40 }
0x1542   : > { %v2474_v41 = vpop.xlane.xlu0 %2473 }
0x1543   : > { %v2476_v42 = vsub.f32 %v3958_v35, %v2474_v41  ;;  %v2471_v43 = vpop.xlane.xlu1 %2470 }
0x1544   : > { %v2475_v49 = vsub.f32 %v2460_v46, %v2471_v43 }
0x1545   : > { %v2479_v47 = vmul.f32 1.442695, %v2476_v42 }
0x1546   : > { %v2477_v48 = vmul.f32 1.442695, %v2475_v49 }
0x1547   : > { %4469 = vpow2.f32 %v2479_v47 }
0x1548   : > { %4471 = vpow2.f32 %v2477_v48 }
0x154a   : > { %v2676_v54 = vpop.xlane.xlu1 %2675 }
0x154b   : > { %v2678_v25 = vsub.f32 %v3972_v52, %v2676_v54  ;;  %v2673_v58 = vpop.xlane.xlu0 %2672 }
0x154c   : > { %v2677_v59 = vsub.f32 %v2662_v38, %v2673_v58 }
0x154d   : > { %v2681_v50 = vmul.f32 1.442695, %v2678_v25 }
0x154e   : > { %v2679_v60 = vmul.f32 1.442695, %v2677_v59 }
0x154f   : > { %4473 = vpow2.f32 %v2681_v50 }
0x1550   : > { %4475 = vpow2.f32 %v2679_v60 }
0x1551   : > { %v4470_v23 = vpop.eup %4469 }
0x1552   : > { %v4472_v61 = vpop.eup %4471  ;;  %v2484_v62 = vsel %vm820_vm1, %v4470_v23, 0.0 }
0x1553   : > { %2485 = vadd.xlane.f32.xlu1 %v2484_v62  ;;  %v2481_v63 = vsel %vm820_vm1, %v4472_v61, 0.0 }
0x1554   : > { %2482 = vadd.xlane.f32.xlu0 %v2481_v63 }
0x1559   : > { %v4474_v0 = vpop.eup %4473 }
0x155a   : > { %v4476_v1 = vpop.eup %4475  ;;  %v2686_v2 = vsel %vm820_vm1, %v4474_v0, 0.0 }
0x155b   : > { %2687 = vadd.xlane.f32.xlu1 %v2686_v2  ;;  %v2683_v3 = vsel %vm820_vm1, %v4476_v1, 0.0  ;;  %v3625_v2 = vld [vmem:[%s5678_s7 + $0x40] sm:$0xff] }
0x155c   : > { %2684 = vadd.xlane.f32.xlu0 %v2683_v3  ;;  %v3626_v3 = vld [vmem:[%s5678_s7 + $0x48] sm:$0xff] }
0x156c   : > { %4395 = vrot.lane.b32.xlu1 %v5294_v56, %s5726_s27  ;;  %s3702_s27 = sshll.u32 %s4696_s28, 8 }
0x156d   : > { %s5625_s29 = scalar_lea.hbm %s5729_s17, %s3702_s27 }
0x1570   : > { %4400 = vrot.lane.b32.xlu1 %v5292_v51, %s5727_s22 }
0x1572   : > { %4390 = vrot.lane.b32.xlu0 %v5294_v56, %s5725_s24 }
0x1574   : > { %2780 = vrot.lane.b32.xlu1 %v5288_v44, %s5728_s21 }
0x1576   : > { %2782 = vrot.lane.b32.xlu0 %v5302_v57, %s5728_s21 }
0x15e0   : > { %v2486_v8 = vpop.xlane.xlu1 %2485 }
0x15e1   : > { %v2483_v6 = vpop.xlane.xlu0 %2482 }
0x15e2   : > { %4477 = vrcp.f32 %v2483_v6  ;;  %v3627_v6 = vld [vmem:[%s5678_s7 + $0x50] sm:$0xff] }
0x15e3   : > { %4479 = vrcp.f32 %v2486_v8  ;;  %v4225_v8 = vpack.c.bf16 %v3626_v3, %v3625_v2  ;;  %v3649_v2 = vld [vmem:[%s5682_s11 + $0xc0] sm:$0xff]  ;;  %v3651_v3 = vld [vmem:[%s5682_s11 + $0xd0] sm:$0xff] }
0x15e8   : > { %v2688_v9 = vpop.xlane.xlu1 %2687 }
0x15e9   : > { %v2685_v10 = vpop.xlane.xlu0 %2684 }
0x15ea   : > { %4481 = vrcp.f32 %v2685_v10 }
0x15eb   : > { %4483 = vrcp.f32 %v2688_v9  ;;  %v3628_v9 = vld [vmem:[%s5678_s7 + $0x58] sm:$0xff] }
0x15ec   : > { %v4478_v11 = vpop.eup %4477  ;;  %v4396_v12 = vpop.permute.xlu1 %4395  ;;  %v4229_v10 = vpack.c.bf16 %v3628_v9, %v3627_v6  ;;  %v4251_v6 = vpack.c.bf16 %v3651_v3, %v3649_v2  ;;  %v3656_v9 = vld [vmem:[%s5682_s11 + $0xf8] sm:$0xff] }
0x15ed   : > { %v4391_v51 = vpop.permute.xlu0 %4390  ;;  %v2489_v13 = vmul.f32 %v4478_v11, %v4472_v61  ;;  %v4398_v14 = vunpack.i.h.bf16 %v4396_v12  ;;  %v4397_v15 = vunpack.i.l.bf16 %v4396_v12  ;;  %v4480_v18 = vpop.eup %4479  ;;  %v3629_v11 = vld [vmem:[%s5678_s7 + $0x60] sm:$0xff]  ;;  %v3630_v12 = vld [vmem:[%s5678_s7 + $0x68] sm:$0xff]  ;;  %v3671_v2 = vld [vmem:[%s5684_s13 + $0x158] sm:$0xff] }
0x15ee   : > { %v4393_v16 = vunpack.i.h.bf16 %v4391_v51  ;;  %v4392_v17 = vunpack.i.l.bf16 %v4391_v51  ;;  %v2490_v26 = vmul.f32 %v4480_v18, %v4470_v23  ;;  %v4233_v51 = vpack.c.bf16 %v3630_v12, %v3629_v11  ;;  %v3653_v11 = vld [vmem:[%s5682_s11 + $0xe0] sm:$0xff]  ;;  %v3655_v12 = vld [vmem:[%s5682_s11 + $0xf0] sm:$0xff] }
0x15ef   : > { %3963 = vmatprep.mubr.msk.f32.mxu0 %vm820_vm1, %v2489_v13  ;;  %v4211_v20 = vpack.c.bf16 %v4398_v14, %v4397_v15  ;;  %v3631_v13 = vld [vmem:[%s5678_s7 + $0x70] sm:$0xff]  ;;  %v3632_v14 = vld [vmem:[%s5678_s7 + $0x78] sm:$0xff] }
0x15f0   : > { %v4201_v44 = vpack.c.bf16 %v4393_v16, %v4392_v17  ;;  %v4401_v57 = vpop.permute.xlu1 %4400  ;;  %v4237_v15 = vpack.c.bf16 %v3632_v14, %v3631_v13  ;;  %v3676_v13 = vld [vmem:[%s5684_s13 + $0x180] sm:$0xff]  ;;  %v3677_v14 = vld [vmem:[%s5684_s13 + $0x188] sm:$0xff] }
0x15f1   : > { %v4403_v19 = vunpack.i.h.bf16 %v4401_v57  ;;  %v4402_v21 = vunpack.i.l.bf16 %v4401_v57  ;;  %v2783_v32 = vpop.permute.xlu0 %2782 }
0x15f2   : > { %4202 = vmatprep.subr.bf16.mxu0 %v4201_v44 }
0x15f3   : > { %4204 = vmatpush3.bf16.msra.mxu0 %v4201_v44  ;;  %v4215_v29 = vpack.c.bf16 %v4403_v19, %v4402_v21 }
0x15f4   : > { %v4482_v22 = vpop.eup %4481  ;;  %4212 = vmatprep.subr.bf16.mxu0 %v4211_v20  ;;  %v2781_v31 = vpop.permute.xlu1 %2780 }
0x15f5   : > { %v4484_v27 = vpop.eup %4483  ;;  %v2691_v28 = vmul.f32 %v4482_v22, %v4476_v1 }
0x15f6   : > { %3964 = vmatmul.mubr.msk.f32.vlgmr.msra.gmra.mrb[16].mxu0 %vm820_vm1, %v2490_v26  ;;  %v2692_v30 = vmul.f32 %v4484_v27, %v4474_v0 }
0x15f7   : > { %4214 = vmatpush3.bf16.msra.mxu0 %v4211_v20  ;;  %3977 = vmatprep.mubr.msk.f32.mxu0 %vm820_vm1, %v2691_v28 }
0x15f8   : > { %4217 = vmatprep.subr.msk.bf16.mxu0 %vm4905_vm2, %v4215_v29 }
0x15fa   : > { %3978 = vmatmul.mubr.msk.f32.vlgmr.msra.gmra.mrb[18].mxu0 %vm820_vm1, %v2692_v30 }
0x15fb   : > { %3984 = vmatprep.mubr.msk.f32.mxu0 %vm820_vm1, %v2781_v31 }
0x1600   : > { %4220 = vmatpush3.bf16.xpose.msk.msra.mxu0 %vm4905_vm2, %v4215_v29 }
0x1607   : > { %3985 = vmatmul.mubr.msk.f32.vlgmr.msra.gmra.mrb[20].mxu0 %vm820_vm1, %v2783_v32 }
0x1608   : > { %3258 = vmatprep.mubr.f32.mxu0 %v4574_v24 }
0x16c9   : > { %v3965_v35 = vpop.f32.mrb[16].mxu0 }
0x16ca   : > { %v2571_v46 = vpop.f32.mrb[17].mxu0 }
0x16cd   : > { %v3979_v36 = vpop.f32.mrb[18].mxu0 }
0x16ce   : > { %v2771_v37 = vpop.f32.mrb[19].mxu0 }
0x16da   : > { %v3986_v52 = vpop.f32.mrb[20].mxu0 }
0x16db   : > { %v2862_v38 = vpop.f32.mrb[21].mxu0  ;;  %v2874_v39 = vsel %vm820_vm1, %v3986_v52, -inf }
0x16dc   : > { %2875 = vmax.xlane.f32.xlu0 %v2874_v39  ;;  %v2871_v40 = vsel %vm820_vm1, %v2862_v38, -inf }
0x16dd   : > { %2872 = vmax.xlane.f32.xlu1 %v2871_v40 }
0x16ee   : > { %4405 = vrot.lane.b32.xlu1 %v5294_v56, %s5728_s21 }
0x16f2   : > { %2984 = vrot.lane.b32.xlu1 %v3965_v35, %s5727_s22 }
0x16f6   : > { %2990 = vrot.lane.b32.xlu1 %v2771_v37, %s5724_s30 }
0x16fa   : > { %2992 = vrot.lane.b32.xlu1 %v3979_v36, %s5724_s30 }
0x1769   : > { %v2876_v55 = vpop.xlane.xlu0 %2875 }
0x176a   : > { %v2878_v41 = vsub.f32 %v3986_v52, %v2876_v55  ;;  %v2873_v42 = vpop.xlane.xlu1 %2872 }
0x176b   : > { %v2877_v43 = vsub.f32 %v2862_v38, %v2873_v42 }
0x176c   : > { %v2881_v49 = vmul.f32 1.442695, %v2878_v41 }
0x176d   : > { %v2879_v47 = vmul.f32 1.442695, %v2877_v43 }
0x176e   : > { %v4406_v48 = vpop.permute.xlu1 %4405 }
0x176f   : > { %4485 = vpow2.f32 %v2879_v47  ;;  %v4408_v54 = vunpack.i.h.bf16 %v4406_v48  ;;  %v4407_v25 = vunpack.i.l.bf16 %v4406_v48  ;;  %v3642_v47 = vld [vmem:[%s5682_s11 + $0x88] sm:$0xff]  ;;  %v3644_v48 = vld [vmem:[%s5682_s11 + $0x98] sm:$0xff] }
0x1770   : > { %4487 = vpow2.f32 %v2881_v49 }
0x1771   : > { %v4221_v58 = vpack.c.bf16 %v4408_v54, %v4407_v25  ;;  %v4241_v54 = vpack.c.bf16 %v3644_v48, %v3642_v47  ;;  %v3641_v25 = vld [vmem:[%s5682_s11 + $0x80] sm:$0xff] }
0x1772   : > { %v2985_v44 = vpop.permute.xlu1 %2984 }
0x1773   : > { %4222 = vmatprep.subr.bf16.mxu1 %v4221_v58  ;;  %v3005_v22 = vsel %vm820_vm1, %v5336_v33, %v2985_v44  ;;  %4242 = vmatprep.subr.bf16.mxu0 %v4241_v54  ;;  %v3678_v44 = vld [vmem:[%s5684_s13 + $0x190] sm:$0xff]  ;;  %v3683_v54 = vld [vmem:[%s5684_s13 + $0x1b8] sm:$0xff] }
0x1774   : > { %4224 = vmatpush3.bf16.msra.mxu1 %v4221_v58  ;;  %v3643_v58 = vld [vmem:[%s5682_s11 + $0x90] sm:$0xff] }
0x1775   : > { %4226 = vmatprep.subr.bf16.mxu1 %v4225_v8 }
0x1776   : > { %v2991_v57 = vpop.permute.xlu1 %2990 }
0x1779   : > { %v4486_v56 = vpop.eup %4485 }
0x177a   : > { %v2883_v59 = vsel %vm820_vm1, %v4486_v56, 0.0  ;;  %v4488_v50 = vpop.eup %4487  ;;  %v2993_v20 = vpop.permute.xlu1 %2992 }
0x177b   : > { %2884 = vadd.xlane.f32.xlu0 %v2883_v59  ;;  %v2886_v60 = vsel %vm820_vm1, %v4488_v50, 0.0  ;;  %v3007_v28 = vsel %vm1637_vm3, %v3005_v22, %v2993_v20  ;;  %v3646_v59 = vld [vmem:[%s5682_s11 + $0xa8] sm:$0xff]  ;;  %v3680_v22 = vld [vmem:[%s5684_s13 + $0x1a0] sm:$0xff] }
0x177f   : > { %2887 = vadd.xlane.f32.xlu0 %v2886_v60 }
0x1795   : > { %2982 = vrot.lane.b32.xlu0 %v2571_v46, %s5727_s22  ;;  %s541_s22 = scalar_lea.vmem [#allocation2], %s3537_s26  ;;  %s4582_s26 = smov [#allocation2]  }
0x1796   : > { %s3471_s21 = sshll.u32 %s541_s22, 4  ;;  %s4513_s30 = sshll.u32 %s4582_s26, 4  ;;  %s5627_s21 = int_to_ptr.vmem [resolvable:$true] %s3471_s21  ;;  %s4514_s30 = int_to_ptr.vmem [resolvable:$false] %s4513_s30 }
0x1797   : > { %s4509_s28 = scalar_lea.vmem %s5627_s21, 256  ;;  %s4515_s24 = scalar_lea.vmem %s4514_s30, 512 }
0x1798   : > { %p4510_p11 = scmp.ne.s32.totalorder %s5627_s21, %s4509_s28  ;;  %p4516_p0 = scmp.lt.s32.totalorder %s5627_s21, %s4514_s30 }
0x1799   : > { %p4517_p1 = scmp.lt.s32.totalorder %s4515_s24, %s4509_s28 }
0x179a   : > { %p4511_p12 = pnand %p4510_p11, %p4713_p5 }
0x179b   : > { %p4518_p2 = por %p4517_p1, %p4516_p0 }
0x179c   : > { %p4512_p13 = pneg %p4511_p12 }
0x179e   : > { %p4519_p3 = pnand %p4518_p2, %p4512_p13 }
0x1808   : > { %v2885_v23 = vpop.xlane.xlu0 %2884 }
0x1809   : > { %4489 = vrcp.f32 %v2885_v23  ;;  %v3645_v23 = vld [vmem:[%s5682_s11 + $0xa0] sm:$0xff] }
0x180c   : > { %v2888_v61 = vpop.xlane.xlu0 %2887 }
0x180d   : > { %4491 = vrcp.f32 %v2888_v61  ;;  %v3647_v61 = vld [vmem:[%s5682_s11 + $0xb0] sm:$0xff] }
0x1810   : > { %v2983_v18 = vpop.permute.xlu0 %2982 }
0x1811   : > { %v3004_v19 = vsel %vm820_vm1, %v5338_v34, %v2983_v18  ;;  %v3636_v34 = vld [vmem:[%s5679_s8 + $0x1] ss:$0 sm:$0xff] }
0x1812   : > { %v3006_v26 = vsel %vm1637_vm3, %v3004_v19, %v2991_v57  ;;  %v3679_v57 = vld [vmem:[%s5684_s13 + $0x198] sm:$0xff]  ;;  %v3662_v19 = vld [vmem:[%s5684_s13 + $0x110] sm:$0xff] }
0x1813   : > { %v4490_v62 = vpop.eup %4489  ;;  %v4261_v20 = vpack.c.bf16 %v3679_v57, %v3678_v44  ;;  %v3657_v44 = vld [vmem:[%s5683_s12 + $0x2] sm:$0x3] }
0x1814   : > { %v2891_v63 = vmul.f32 %v4490_v62, %v4486_v56  ;;  %v4243_v56 = vpack.c.bf16 %v3643_v58, %v3641_v25  ;;  %v4247_v62 = vpack.c.bf16 %v3647_v61, %v3645_v23  ;;  %v3669_v23 = vld [vmem:[%s5684_s13 + $0x148] sm:$0xff]  ;;  %v3181_v57 = vrot.slane %v3657_v44, %v1807_v5 }
0x1816   : > { %3991 = vmatprep.mubr.msk.f32.mxu1 %vm820_vm1, %v2891_v63  ;;  %4244 = vmatpush1.bf16.msra.mxu0 %v4243_v56  ;;  %v3650_v63 = vld [vmem:[%s5682_s11 + $0xc8] sm:$0xff]  ;;  %v3684_v56 = vld [vmem:[%s5684_s13 + $0x1c0] sm:$0xff] }
0x1817   : > { %v4492_v0 = vpop.eup %4491 }
0x1818   : > { %v2892_v1 = vmul.f32 %v4492_v0, %v4488_v50  ;;  %v3648_v50 = vld [vmem:[%s5682_s11 + $0xb8] sm:$0xff] }
0x1819   : > { %v4245_v60 = vpack.c.bf16 %v3648_v50, %v3646_v59  ;;  %v3652_v0 = vld [vmem:[%s5682_s11 + $0xd8] sm:$0xff]  ;;  %v3685_v59 = vld [vmem:[%s5684_s13 + $0x1c8] sm:$0xff] }
0x181a   : > { %3992 = vmatmul.mubr.msk.f32.vlgmr.msra.gmra.mrb[30].mxu1 %vm820_vm1, %v2892_v1  ;;  %v4249_v1 = vpack.c.bf16 %v3652_v0, %v3650_v63  ;;  %v4273_v50 = vpack.c.bf16 %v3685_v59, %v3684_v56  ;;  %v3687_v63 = vld [vmem:[%s5684_s13 + $0x1d8] sm:$0xff] }
0x181b   : > { %4228 = vmatpush3.bf16.msra.mxu1 %v4225_v8  ;;  %4246 = vmatprep.subr.bf16.mxu0 %v4245_v60  ;;  %v3654_v8 = vld [vmem:[%s5682_s11 + $0xe8] sm:$0xff]  ;;  %v3668_v60 = vld [vmem:[%s5684_s13 + $0x140] sm:$0xff] }
0x181c   : > { %4230 = vmatprep.subr.bf16.mxu1 %v4229_v10  ;;  %4248 = vmatpush1.bf16.msra.mxu0 %v4247_v62  ;;  %v4275_v61 = vpack.c.bf16 %v3669_v23, %v3668_v60  ;;  %v3686_v62 = vld [vmem:[%s5684_s13 + $0x1d0] sm:$0xff] }
0x181d   : > { %4250 = vmatprep.subr.bf16.mxu0 %v4249_v1  ;;  %v4277_v0 = vpack.c.bf16 %v3687_v63, %v3686_v62  ;;  %v3670_v1 = vld [vmem:[%s5684_s13 + $0x150] sm:$0xff] }
0x181e   : > { %v4279_v3 = vpack.c.bf16 %v3671_v2, %v3670_v1 }
0x181f   : > { %4232 = vmatpush3.bf16.msra.mxu1 %v4229_v10  ;;  %v4253_v10 = vpack.c.bf16 %v3656_v9, %v3654_v8  ;;  %v3689_v8 = vld [vmem:[%s5684_s13 + $0x1e8] sm:$0xff] }
0x1820   : > { %4234 = vmatprep.subr.bf16.mxu1 %v4233_v51  ;;  %4252 = vmatpush1.bf16.msra.mxu0 %v4251_v6  ;;  %v3688_v6 = vld [vmem:[%s5684_s13 + $0x1e0] sm:$0xff] }
0x1821   : > { %4254 = vmatprep.subr.bf16.mxu0 %v4253_v10  ;;  %v4281_v9 = vpack.c.bf16 %v3689_v8, %v3688_v6  ;;  %v3672_v10 = vld [vmem:[%s5684_s13 + $0x160] sm:$0xff] }
0x1823   : > { %4236 = vmatpush3.bf16.msra.mxu1 %v4233_v51  ;;  %v4255_v51 = vpack.c.bf16 %v3655_v12, %v3653_v11  ;;  %v3673_v11 = vld [vmem:[%s5684_s13 + $0x168] sm:$0xff] }
0x1824   : > { %4238 = vmatprep.subr.bf16.mxu1 %v4237_v15  ;;  %v4283_v12 = vpack.c.bf16 %v3673_v11, %v3672_v10 }
0x1825   : > { %4256 = vmatpush1.bf16.msra.mxu0 %v4255_v51  ;;  %v3690_v51 = vld [vmem:[%s5684_s13 + $0x1f0] sm:$0xff] }
0x1827   : > { %4240 = vmatpush3.bf16.msra.mxu1 %v4237_v15  ;;  %v3660_v15 = vld [vmem:[%s5684_s13 + $0x100] sm:$0xff] }
0x18ed   : > { %v3993_v16 = vpop.f32.mrb[30].mxu1 }
0x18ee   : > { %3000 = vrot.lane.b32.xlu1 %v3993_v16, %s4577_s18  ;;  %v2971_v17 = vpop.f32.mrb[31].mxu1  ;;  %v4257_v16 = vpack.c.bf16 %v3677_v14, %v3676_v13  ;;  %v3691_v13 = vld [vmem:[%s5684_s13 + $0x1f8] sm:$0xff] }
0x18ef   : > { %2998 = vrot.lane.b32.xlu0 %v2971_v17, %s4577_s18  ;;  %v3661_v17 = vld [vmem:[%s5684_s13 + $0x108] sm:$0xff]  ;;  %v4285_v14 = vpack.c.bf16 %v3691_v13, %v3690_v51  ;;  %s5630_s18 = scalar_lea.sflag [#allocation3], %s539_s19 }
0x18f0   : > { %v4259_v18 = vpack.c.bf16 %v3661_v17, %v3660_v15  ;;  %4258 = vmatprep.subr.bf16.mxu1 %v4257_v16  ;;  %v3674_v15 = vld [vmem:[%s5684_s13 + $0x170] sm:$0xff]  ;;  %v3675_v16 = vld [vmem:[%s5684_s13 + $0x178] sm:$0xff] }
0x18f1   : > { %v4287_v17 = vpack.c.bf16 %v3675_v16, %v3674_v15  ;;  %v3694_v15 = vld [vmem:[%s5686_s15] ss:$0 sm:$0xff] }
0x1960   : > { %v3001_v21 = vpop.permute.xlu1 %3000 }
0x1961   : > { %v2999_v27 = vpop.permute.xlu0 %2998  ;;  %v3009_v30 = vsel %vm1640_vm4, %v3007_v28, %v3001_v21  ;;  %v3663_v21 = vld [vmem:[%s5684_s13 + $0x118] sm:$0xff] }
0x1962   : > { %v3008_v29 = vsel %vm1640_vm4, %v3006_v26, %v2999_v27  ;;  %v3681_v26 = vld [vmem:[%s5684_s13 + $0x1a8] sm:$0xff]  ;;  %v4263_v27 = vpack.c.bf16 %v3663_v21, %v3662_v19 }
0x1963   : > { %4010 = vmatprep.mubr.msk.f32.mxu1 %vm582_vm0, %v3008_v29  ;;  %v4265_v28 = vpack.c.bf16 %v3681_v26, %v3680_v22  ;;  %v3664_v29 = vld [vmem:[%s5684_s13 + $0x120] sm:$0xff] }
0x1964   : > { %4011 = vmatmul.mubr.msk.f32.vlgmr.msra.gmra.mrb[32].mxu1 %vm582_vm0, %v3009_v30  ;;  %v3665_v30 = vld [vmem:[%s5684_s13 + $0x128] sm:$0xff] }
0x1965   : > { %4260 = vmatpush3.bf16.msra.mxu1 %v4259_v18  ;;  %v3185_v18 = vrot.slane %v3657_v44, %v1811_v7 }
0x1966   : > { %4262 = vmatprep.subr.bf16.mxu1 %v4261_v20 }
0x1969   : > { %4264 = vmatpush3.bf16.msra.mxu1 %v4263_v27 }
0x196a   : > { %4266 = vmatprep.subr.bf16.mxu1 %v4265_v28 }
0x1a37   : > { %v4012_v31 = vpop.f32.mrb[32].mxu1 }
0x1a38   : > { %v3101_v33 = vadd.f32 %v4012_v31, %v5223_v53  ;;  %v3091_v32 = vpop.f32.mrb[33].mxu1  ;;  %v4267_v31 = vpack.c.bf16 %v3665_v30, %v3664_v29 }
0x1a39   : > { %v3100_v35 = vadd.f32 %v3091_v32, %v5218_v45 }
0x1a3a   : > { %v5422_v46 = vadd.f32 %v3636_v34, %v3101_v33  ;;  %4268 = vmatpush3.bf16.msra.mxu1 %v4267_v31 }
0x1a3b   : > { %v5424_v36 = vadd.f32 %v3636_v34, %v3100_v35 }
0x1a3c   : > { %v3119_v37 = vsel %vm582_vm0, %v5422_v46, 0.0 }
0x1a3d   : > { %3120 = vadd.xlane.f32.xlu1 %v3119_v37  ;;  %v3116_v52 = vsel %vm582_vm0, %v5424_v36, 0.0 }
0x1a3e   : > { %3117 = vadd.xlane.f32.xlu0 %v3116_v52 }
0x1aca   : > { %v3121_v38 = vpop.xlane.xlu1 %3120 }
0x1acb   : > { %v3123_v39 = vmul.f32 0.015625, %v3121_v38  ;;  %v3118_v40 = vpop.xlane.xlu0 %3117 }
0x1acc   : > { %v3122_v55 = vmul.f32 0.015625, %v3118_v40 }
0x1acd   : > { %v5431_v53 = vsub.f32 %v5422_v46, %v3123_v39  ;;  %v3639_v39 = vld [vmem:[%s5680_s9 + $0x1] ss:$0 sm:$0xff] }
0x1ace   : > { %v5434_v45 = vsub.f32 %v5424_v36, %v3122_v55  ;;  %v3640_v55 = vld [vmem:[%s5681_s10 + $0x1] ss:$0 sm:$0xff] }
0x1acf   : > { %v3127_v43 = vmul.f32 %v5431_v53, %v5431_v53 }
0x1ad0   : > { %v3126_v41 = vmul.f32 %v5434_v45, %v5434_v45 }
0x1ad1   : > { %v3131_v49 = vsel %vm582_vm0, %v3127_v43, 0.0 }
0x1ad2   : > { %v3128_v42 = vsel %vm582_vm0, %v3126_v41, 0.0 }
0x1ad3   : > { %3129 = vadd.xlane.f32.xlu0 %v3128_v42 }
0x1ad7   : > { %3132 = vadd.xlane.f32.xlu0 %v3131_v49 }
0x1b60   : > { %v3130_v34 = vpop.xlane.xlu0 %3129 }
0x1b61   : > { %v3134_v33 = vmul.f32 0.015625, %v3130_v34 }
0x1b63   : > { %v3136_v32 = vadd.f32 1e-05, %v3134_v33 }
0x1b64   : > { %v3133_v35 = vpop.xlane.xlu0 %3132 }
0x1b65   : > { %4493 = vrsqrt.f32 %v3136_v32  ;;  %v3135_v37 = vmul.f32 0.015625, %v3133_v35 }
0x1b67   : > { %v3137_v52 = vadd.f32 1e-05, %v3135_v37 }
0x1b69   : > { %4495 = vrsqrt.f32 %v3137_v52 }
0x1b6f   : > { %v4494_v38 = vpop.eup %4493 }
0x1b70   : > { %v3140_v40 = vmul.f32 %v4494_v38, %v5434_v45  ;;  %v3682_v45 = vld [vmem:[%s5684_s13 + $0x1b0] sm:$0xff] }
0x1b71   : > { %v4269_v25 = vpack.c.bf16 %v3683_v54, %v3682_v45 }
0x1b72   : > { %v3148_v41 = vmul.f32 %v3639_v39, %v3140_v40 }
0x1b73   : > { %v4496_v42 = vpop.eup %4495  ;;  %4270 = vmatprep.subr.bf16.mxu1 %v4269_v25  ;;  %v3693_v25 = vld [vmem:[%s5685_s14 + $0x1] ss:$0 sm:$0xff] }
0x1b74   : > { %v3156_v43 = vadd.f32 %v3640_v55, %v3148_v41  ;;  %v3141_v49 = vmul.f32 %v4496_v42, %v5431_v53  ;;  %v3666_v53 = vld [vmem:[%s5684_s13 + $0x130] sm:$0xff] }
0x1b76   : > { %3658 = vmatmul.mubr.msk.f32.vlgmr.msra.gmra.mrb[22].mxu0 %vm582_vm0, %v3156_v43  ;;  %v3149_v47 = vmul.f32 %v3639_v39, %v3141_v49 }
0x1b77   : > { %3264 = vmatprep.mubr.f32.mxu0 %v4574_v24  ;;  %v3667_v24 = vld [vmem:[%s5684_s13 + $0x138] sm:$0xff] }
0x1b78   : > { %v3157_v48 = vadd.f32 %v3640_v55, %v3149_v47  ;;  %v4271_v58 = vpack.c.bf16 %v3667_v24, %v3666_v53 }
0x1b7a   : > { %3659 = vmatmul.mubr.msk.f32.gmra.mrb[24].mxu0 %vm582_vm0, %v3157_v48  ;;  %4272 = vmatpush3.bf16.msra.mxu1 %v4271_v58 }
0x1b7b   : > { %4274 = vmatprep.subr.bf16.mxu1 %v4273_v50 }
0x1b7e   : > { %4276 = vmatpush3.bf16.msra.mxu1 %v4275_v61 }
0x1b7f   : > { %4278 = vmatprep.subr.bf16.mxu1 %v4277_v0 }
0x1b82   : > { %4280 = vmatpush3.bf16.msra.mxu1 %v4279_v3 }
0x1b83   : > { %4282 = vmatprep.subr.bf16.mxu1 %v4281_v9 }
0x1b86   : > { %4284 = vmatpush3.bf16.msra.mxu1 %v4283_v12 }
0x1b87   : > { %4286 = vmatprep.subr.bf16.mxu1 %v4285_v14 }
0x1b8a   : > { %4288 = vmatpush3.bf16.msra.mxu1 %v4287_v17  ;;  %v3695_v17 = vld [vmem:[%s5687_s16] ss:$0 sm:$0xff] }
0x1c49   : > { %v3260_v20 = vpop.f32.mrb[22].mxu0 }
0x1c4a   : > { %v3261_v19 = vadd.f32 %v3260_v20, %v3181_v57  ;;  %v3262_v21 = vpop.f32.mrb[23].mxu0 }
0x1c4b   : > { %v3263_v22 = vadd.f32 %v3262_v21, %v3185_v18 }
0x1c4c   : > { %v3275_v26 = vmul.f32 0.70710677, %v3261_v19  ;;  %v3271_v37 = vmul.f32 0.5, %v3261_v19 }
0x1c4d   : > { %v3276_v27 = vmul.f32 0.70710677, %v3263_v22  ;;  %v3266_v28 = vpop.f32.mrb[24].mxu0  ;;  %v3272_v7 = vmul.f32 0.5, %v3263_v22 }
0x1c4e   : > { %4497 = verf.f32 %v3275_v26  ;;  %v3267_v29 = vadd.f32 %v3266_v28, %v3181_v57  ;;  %v3268_v30 = vpop.f32.mrb[25].mxu0 }
0x1c4f   : > { %4499 = verf.f32 %v3276_v27  ;;  %v3269_v31 = vadd.f32 %v3268_v30, %v3185_v18 }
0x1c50   : > { %v3277_v34 = vmul.f32 0.70710677, %v3267_v29  ;;  %v3273_v43 = vmul.f32 0.5, %v3267_v29 }
0x1c51   : > { %v3278_v33 = vmul.f32 0.70710677, %v3269_v31  ;;  %v3274_v41 = vmul.f32 0.5, %v3269_v31 }
0x1c52   : > { %4501 = verf.f32 %v3277_v34 }
0x1c53   : > { %4503 = verf.f32 %v3278_v33 }
0x1c58   : > { %v4498_v5 = vpop.eup %4497 }
0x1c59   : > { %v4500_v32 = vpop.eup %4499  ;;  %v3283_v4 = vadd.f32 1.0, %v4498_v5 }
0x1c5a   : > { %v3284_v35 = vadd.f32 1.0, %v4500_v32 }
0x1c5b   : > { %v3287_v40 = vmul.f32 %v3283_v4, %v3271_v37 }
0x1c5c   : > { %v4502_v52 = vpop.eup %4501  ;;  %v3288_v38 = vmul.f32 %v3284_v35, %v3272_v7 }
0x1c5d   : > { %v4504_v39 = vpop.eup %4503  ;;  %v3285_v55 = vadd.f32 1.0, %v4502_v52 }
0x1c5e   : > { %v3286_v42 = vadd.f32 1.0, %v4504_v39  ;;  %3388 = vmatprep.mubr.f32.mxu1 %v3288_v38 }
0x1c5f   : > { %3389 = vmatmul.mubr.f32.vlgmr.msra.gmra.mrb[34].mxu1 %v3287_v40  ;;  %v3289_v47 = vmul.f32 %v3285_v55, %v3273_v43 }
0x1c60   : > { %v3290_v49 = vmul.f32 %v3286_v42, %v3274_v41 }
0x1c62   : > { %3393 = vmatprep.mubr.f32.mxu1 %v3290_v49 }
0x1c63   : > { %3394 = vmatmul.mubr.f32.gmra.mrb[36].mxu1 %v3289_v47 }
0x1d32   : > { %v3857_v48 = vpop.f32.mrb[34].mxu1 }
0x1d33   : > { %v3858_v45 = vpop.f32.mrb[35].mxu1 }
0x1d34   : > { %v3859_v54 = vadd.f32 %v3858_v45, %v3857_v48 }
0x1d36   : > { %v3399_v53 = vadd.f32 %v3859_v54, %v5424_v36  ;;  %v3860_v24 = vpop.f32.mrb[36].mxu1 }
0x1d37   : > { %v3861_v58 = vpop.f32.mrb[37].mxu1 }
0x1d38   : > { %v3862_v56 = vadd.f32 %v3861_v58, %v3860_v24  ;;  %v3409_v59 = vadd.f32 %v3693_v25, %v3399_v53 }
0x1d3a   : > { %v3400_v50 = vadd.f32 %v3862_v56, %v5422_v46  ;;  %v3413_v60 = vsel %vm582_vm0, %v3409_v59, 0.0 }
0x1d3b   : > { %3414 = vadd.xlane.f32.xlu0 %v3413_v60 }
0x1d3c   : > { %v3410_v23 = vadd.f32 %v3693_v25, %v3400_v50 }
0x1d3e   : > { %v3416_v61 = vsel %vm582_vm0, %v3410_v23, 0.0 }
0x1d3f   : > { %3417 = vadd.xlane.f32.xlu1 %v3416_v61 }
0x1dc8   : > { %v3415_v62 = vpop.xlane.xlu0 %3414 }
0x1dc9   : > { %v3419_v63 = vmul.f32 0.015625, %v3415_v62 }
0x1dcb   : > { %v3421_v0 = vsub.f32 %v3409_v59, %v3419_v63 }
0x1dcc   : > { %v3418_v1 = vpop.xlane.xlu1 %3417 }
0x1dcd   : > { %v3420_v2 = vmul.f32 0.015625, %v3418_v1  ;;  %v3423_v36 = vmul.f32 %v3421_v0, %v3421_v0 }
0x1dcf   : > { %v3422_v3 = vsub.f32 %v3410_v23, %v3420_v2  ;;  %v3425_v6 = vsel %vm582_vm0, %v3423_v36, 0.0 }
0x1dd0   : > { %3426 = vadd.xlane.f32.xlu0 %v3425_v6 }
0x1dd1   : > { %v3424_v8 = vmul.f32 %v3422_v3, %v3422_v3 }
0x1dd3   : > { %v3428_v46 = vsel %vm582_vm0, %v3424_v8, 0.0 }
0x1dd4   : > { %3429 = vadd.xlane.f32.xlu1 %v3428_v46 }
0x1e5d   : > { %v3427_v9 = vpop.xlane.xlu0 %3426 }
0x1e5e   : > { %v3431_v10 = vmul.f32 0.015625, %v3427_v9 }
0x1e60   : > { %v3433_v11 = vadd.f32 1e-05, %v3431_v10 }
0x1e61   : > { %v3430_v12 = vpop.xlane.xlu1 %3429 }
0x1e62   : > { %4505 = vrsqrt.f32 %v3433_v11  ;;  %v3432_v51 = vmul.f32 0.015625, %v3430_v12 }
0x1e64   : > { %v3434_v13 = vadd.f32 1e-05, %v3432_v51 }
0x1e66   : > { %4507 = vrsqrt.f32 %v3434_v13 }
0x1e6c   : > { %v4506_v14 = vpop.eup %4505 }
0x1e6d   : > { %v3437_v16 = vmul.f32 %v4506_v14, %v3421_v0 }
0x1e6f   : > { %v3445_v44 = vmul.f32 %v3694_v15, %v3437_v16 }
0x1e70   : > { %v4508_v57 = vpop.eup %4507 }
0x1e71   : > { %v3453_v18 = vadd.f32 %v3695_v17, %v3445_v44  ;;  %v3438_v20 = vmul.f32 %v4508_v57, %v3422_v3 }
0x1e73   : > { %v3446_v19 = vmul.f32 %v3694_v15, %v3438_v20  ;;  %3455 = vst.msk [vmem:[%s541_s22] sm:$0xff] %vm582_vm0, %v3453_v18 }
0x1e75   : > { %v3454_v21 = vadd.f32 %v3695_v17, %v3446_v19 }
0x1e77   : > { %3456 = vst.msk [vmem:[%s541_s22 + $0x8] sm:$0xff] %vm582_vm0, %v3454_v21 }
0x1e78   : > { %4522 = shalt.err (!%p4519_p3)
}
0x1e79   : > { %s4523_s19 = scalar_lea.hbm %s5625_s29, 256  ;;  %s4527_s0 = scalar_lea.hbm %s5729_s17, 512 }
0x1e7a   : > { %p4524_p4 = scmp.ne.s32.totalorder %s5625_s29, %s4523_s19  ;;  %p4528_p9 = scmp.lt.u32.totalorder %s5625_s29, %s5729_s17 }
0x1e7b   : > { %p4529_p10 = scmp.lt.u32.totalorder %s4527_s0, %s4523_s19  ;;  %p4531_p12 = scmp.lt.u32.totalorder %s4523_s19, %s5625_s29 }
0x1e7c   : > { %p4525_p7 = pnand %p4524_p4, %p4713_p5 }
0x1e7d   : > { %p4530_p11 = por %p4529_p10, %p4528_p9 }
0x1e7e   : > { %p4526_p8 = pneg %p4525_p7 }
0x1e7f   : > { %p4532_p13 = por %p4531_p12, %p4530_p11 }
0x1e81   : > { %p4533_p0 = pnand %p4532_p13, %p4526_p8 }
0x1e83   : > { %4536 = shalt.err (!%p4533_p0)
}
0x1e84   : > { %s4583_s28 = smov 128   ;;  %s4584_s30 = smov 8  }
0x1e85   : > { %4289 = dma.vmem_to_hbm [thread:$0]  (%p4713_p5), %s5627_s21, 256, %s5625_s29, %s5630_s18, %s4583_s28, %s4583_s28, %s4584_s30  }
0x1e86 PF: > { %s5730_s24 = sld [smem:[#allocation7_spill]]  ;;  %s5731_s27 = sld [smem:[#allocation5_spill]] }
0x1e8c   : > { %p4295_p1 = scmp.ge.s32.totalorder %s5730_s24, 2  ;;  %s3486_s20 = sand.u32 1, %s5731_s27  }
0x1e8d   : > { %s3487_s19 = scalar_lea.sflag [#allocation3], %s3486_s20 }
0x1e8e   : > { %p4292_p2 = pnand %p4295_p1, %p4717_p6 }
0x1e90   : > { %4554 = dma.done.wait (!%p4292_p2), %s3487_s19, 256  }
0x1e91   : > { %4556 = vsyncadd (!%p4292_p2), %s3487_s19, 4294967040  ;;  %s5733_s27 = sld [smem:[#allocation8_spill]]  ;;  %s5734_s0 = sld [smem:[#allocation6_spill]] }
0x1e92   : > { %s5735_s26 = sld [smem:[#allocation9_spill]]  ;;  %s5736_s24 = smov %s4563_s25 }
0x1e97   : > { %p27_p3 = scmp.ge.s32.totalorder %s5733_s27, 4   ;;  %s5737_s25 = smov %s5734_s0 }
0x1e99   :  { %29 = sbr.rel (!%p27_p3) target bundleno = 7 (0x7), region = 134 }
0x1ea0   :  { %3492 = vsyncpa [#allocation3], 1 }
0x1ea1   :  { %3494 = vsyncpa [#allocation3 + $0x1], 1 }

</bundles_post_ra>
